<compile_context>
chip_gen: v7x
topology: tpu7x:2x2x1
jax: 0.10.0
libtpu: 0.0.40
codegen_flags: <defaults>
</compile_context>

<pallas_src>
import functools
import math

import jax
import jax.numpy as jnp
from jax.experimental import pallas as pl
from jax.experimental.pallas import tpu as pltpu


# ----------------------------- in-kernel helpers -----------------------------

def _erf(x):
    # Abramowitz & Stegun 7.1.26 rational approximation (max abs err 1.5e-7);
    # one exp (EUP slot) + a short VALU polynomial, lowers cleanly on Mosaic.
    a1, a2, a3, a4, a5 = 0.254829592, -0.284496736, 1.421413741, -1.453152027, 1.061405429
    p = 0.3275911
    ax = jnp.abs(x)
    t = 1.0 / (1.0 + p * ax)
    poly = ((((a5 * t + a4) * t + a3) * t + a2) * t + a1) * t
    y = 1.0 - poly * jnp.exp(-ax * ax)
    return jnp.where(x >= 0, y, -y)


_INV_SQRT2 = 1.0 / math.sqrt(2.0)


def _gelu_exact(x):
    # F.gelu default (erf-based), matching the PyTorch module.
    return 0.5 * x * (1.0 + _erf(x * _INV_SQRT2))


def _layernorm(x, g, b, eps=1e-5):
    mu = jnp.mean(x, axis=-1, keepdims=True)
    var = jnp.mean((x - mu) ** 2, axis=-1, keepdims=True)
    return (x - mu) * jax.lax.rsqrt(var + eps) * g + b


def _bf16(x):
    return x.astype(jnp.bfloat16)


def _round_up(x, m):
    return (x + m - 1) // m * m


def _vmem_limit(nbytes):
    # Real block-sum estimate x2 safety margin; never below the conservative
    # default (16 MiB) and clamped to the largest physical VMEM (128 MiB).
    return int(min(128 << 20, max(16 << 20, 2 * nbytes + (2 << 20))))


# ------------------------------ Pallas kernels -------------------------------

def transformer_stack_kernel(x_ref, wqkv_ref, bqkv_ref, wo_ref,
                             w1_ref, b1_ref, w2_ref, dvec_ref, fln_ref,
                             o_ref, *, batch_per_tile, seq, num_heads):
    """All encoder layers for one token tile.

    grid = (token_tiles, num_layers): axis 0 'parallel' (independent token
    tiles -> megacore on v7x), axis 1 'arbitrary' (sequential layers).
    The residual stream lives in the o_ref output block (VMEM-resident across
    the layer axis since its block index is constant there); stacked per-layer
    weights are streamed by BlockSpec (layer l+1 prefetches under layer l).
    """
    layer = pl.program_id(1)
    n_layers = pl.num_programs(1)
    Bt, S, H = batch_per_tile, seq, num_heads
    D = x_ref.shape[-1]
    Dh = D // H
    rows = Bt * S
    scale = 1.0 / math.sqrt(Dh)

    @pl.when(layer == 0)
    def _():
        o_ref[...] = x_ref[...]          # load the embeddings once per tile

    x = o_ref[...]                       # (Bt*S, D) f32 residual stream

    # ---- fused QKV projection: one MXU-shaped (rows, D) @ (D, 3D) matmul ----
    qkv = jnp.dot(_bf16(x), wqkv_ref[0],
                  preferred_element_type=jnp.float32) + bqkv_ref[0]   # (rows, 3D)
    qkv = _bf16(qkv)

    # additive causal mask built in-kernel (iota + select, no HBM traffic)
    rix = jax.lax.broadcasted_iota(jnp.int32, (S, S), 0)
    cix = jax.lax.broadcasted_iota(jnp.int32, (S, S), 1)
    neg = jnp.where(cix <= rix, 0.0, -1e30).astype(jnp.float32)       # (S, S)

    # ---- self-attention: per-head matmuls batched over the tile's batch dim.
    # Every matmul is a rank-3 leading-batch dot_general contracting the last
    # dims (transposed-RHS MXU path), so no k.T transpose materializes.
    # TODO(synk): at large S switch to a flash-style online-softmax KV loop so
    #   the (S, S) scores never fully materialize.
    head_ctx = []
    for h in range(H):                   # short static loop over heads only
        lo = h * Dh
        qh = qkv[:, lo:lo + Dh].reshape(Bt, S, Dh)
        kh = qkv[:, D + lo:D + lo + Dh].reshape(Bt, S, Dh)
        vh = qkv[:, 2 * D + lo:2 * D + lo + Dh].reshape(Bt, S, Dh)
        s = jnp.einsum("bqd,bkd->bqk", qh, kh,
                       preferred_element_type=jnp.float32) * scale + neg[None]
        s = s - jnp.max(s, axis=-1, keepdims=True)
        p = jnp.exp(s)
        p = p * pl.reciprocal(jnp.sum(p, axis=-1, keepdims=True), approx=True)
        head_ctx.append(jnp.einsum("bqk,bkd->bqd", _bf16(p), vh,
                                   preferred_element_type=jnp.float32))
    ctx = jnp.concatenate(head_ctx, axis=-1).reshape(rows, D)         # (rows, D)

    # per-layer (D,)-wide vectors arrive as one stacked (6, D) block
    dv = dvec_ref[0]
    bo, ln1g, ln1b = dv[0:1], dv[1:2], dv[2:3]
    b2, ln2g, ln2b = dv[3:4], dv[4:5], dv[5:6]

    # single fused output projection (K = D instead of H matmuls with K = Dh)
    attn = jnp.dot(_bf16(ctx), wo_ref[0],
                   preferred_element_type=jnp.float32) + bo
    # dropout(0.1) inside the layer is identity at eval time
    x = _layernorm(x + attn, ln1g, ln1b)

    # ---- feed-forward (D -> 2D -> D, exact erf GELU) ----
    h1 = jnp.dot(_bf16(x), w1_ref[0],
                 preferred_element_type=jnp.float32) + b1_ref[0]
    h1 = _gelu_exact(h1)
    ff = jnp.dot(_bf16(h1), w2_ref[0],
                 preferred_element_type=jnp.float32) + b2

    x = _layernorm(x + ff, ln2g, ln2b)

    o_ref[...] = x                       # stays VMEM-resident for next layer

    @pl.when(layer == n_layers - 1)
    def _():
        # final LayerNorm folded into the last-layer epilogue so lm_head is a
        # pure matmul (no per-vocab-tile LN recompute / gamma-beta DMAs).
        o_ref[...] = _layernorm(x, fln_ref[0:1], fln_ref[1:2])


def lm_head_kernel(x_ref, wout_ref, o_ref):
    # Final LayerNorm already applied in the stack epilogue -> pure matmul.
    o_ref[...] = jnp.dot(_bf16(x_ref[...]), wout_ref[...],
                         preferred_element_type=jnp.float32)


# ------------------------------ Python wrappers -------------------------------

def _num_token_tiles(batch):
    # v7x has 2 TensorCores per chip: split the token dim so the leading
    # 'parallel' grid axis shards across them.  v5e/v6e have a single TC,
    # where extra token tiles would only re-stream the per-layer weights.
    try:
        kind = jax.devices()[0].device_kind.lower()
    except Exception:
        kind = ""
    return 2 if ("v7" in kind and batch % 2 == 0 and batch >= 2) else 1


def transformer_stack(x2d, p, *, batch, seq, num_heads, token_tiles=None):
    N, D = x2d.shape                      # N = B * S
    L, _, F = p["w1"].shape
    if token_tiles is None:
        token_tiles = _num_token_tiles(batch)
    assert batch % token_tiles == 0
    Bt = batch // token_tiles
    Nt = Bt * seq

    # consolidate the six (D,)-wide per-layer vectors into one streamed block
    dvecs = jnp.stack([p["bo"], p["ln1g"], p["ln1b"],
                       p["b2"], p["ln2g"], p["ln2b"]], axis=1)        # (L, 6, D)
    fln = jnp.stack([p["final_ln_g"], p["final_ln_b"]], axis=0)       # (2, D)
    bqkv = p["bqkv"][:, None, :]                                      # (L, 1, 3D)
    b1 = p["b1"][:, None, :]                                          # (L, 1, F)

    tile2 = lambda t, l: (t, 0)
    const2 = lambda t, l: (0, 0)
    layer3 = lambda t, l: (l, 0, 0)

    # VMEM budget from real block sums: streamed bf16 weights (double
    # buffered) + streamed f32 vectors + resident x / output blocks.
    weight_bytes = 2 * 2 * (D * 3 * D + D * D + 2 * D * F)
    vec_bytes = 2 * 4 * (3 * D + F + 6 * D + 2 * D)
    act_bytes = 2 * Nt * D * 4
    limit = _vmem_limit(weight_bytes + vec_bytes + act_bytes)

    kernel = functools.partial(transformer_stack_kernel,
                               batch_per_tile=Bt, seq=seq, num_heads=num_heads)
    return pl.pallas_call(
        kernel,
        out_shape=jax.ShapeDtypeStruct((N, D), jnp.float32),
        grid=(token_tiles, L),
        in_specs=[
            pl.BlockSpec((Nt, D), tile2),            # x (read at layer 0 only)
            pl.BlockSpec((1, D, 3 * D), layer3),     # wqkv  (bf16)
            pl.BlockSpec((1, 1, 3 * D), layer3),     # bqkv
            pl.BlockSpec((1, D, D), layer3),         # wo    (bf16)
            pl.BlockSpec((1, D, F), layer3),         # w1    (bf16)
            pl.BlockSpec((1, 1, F), layer3),         # b1
            pl.BlockSpec((1, F, D), layer3),         # w2    (bf16)
            pl.BlockSpec((1, 6, D), layer3),         # stacked bo/ln1/b2/ln2
            pl.BlockSpec((2, D), const2),            # final LN gamma/beta
        ],
        out_specs=pl.BlockSpec((Nt, D), tile2),      # resident residual stream
        compiler_params=pltpu.CompilerParams(
            dimension_semantics=("parallel", "arbitrary"),
            vmem_limit_bytes=limit),
    )(x2d, p["wqkv"], bqkv, p["wo"], p["w1"], b1, p["w2"], dvecs, fln)


def lm_head(x2d, w_out, *, vt=512):
    N, D = x2d.shape
    V = w_out.shape[1]
    vt = min(vt, _round_up(V, 128))       # lane/MXU-aligned vocab tile
    Vp = _round_up(V, vt)                 # pad once in the wrapper: handles
    if Vp != V:                           # vocabs like 50257 without falling
        w_out = jnp.pad(w_out, ((0, 0), (0, Vp - V)))   # back to resident (D,V)
    n_tiles = Vp // vt

    limit = _vmem_limit(N * D * 4 + 2 * (D * vt * 2) + 2 * (N * vt * 4))
    out = pl.pallas_call(
        lm_head_kernel,
        out_shape=jax.ShapeDtypeStruct((N, Vp), jnp.float32),
        grid=(n_tiles,),
        in_specs=[
            pl.BlockSpec((N, D), lambda j: (0, 0)),
            pl.BlockSpec((D, vt), lambda j: (0, j)),   # vocab-tiled bf16 weight
        ],
        out_specs=pl.BlockSpec((N, vt), lambda j: (0, j)),
        compiler_params=pltpu.CompilerParams(
            dimension_semantics=("parallel",),
            vmem_limit_bytes=limit),
    )(x2d, w_out)
    return out[:, :V] if Vp != V else out


def gpt_forward(params, input_ids, num_heads):
    """Full forward pass (embedding gather in plain JAX, hot paths in Pallas)."""
    B, S = input_ids.shape
    D = params["tok_emb"].shape[1]
    tok = jnp.take(params["tok_emb"], input_ids, axis=0)          # (B, S, D)
    pos = params["pos_emb"][:S][None, :, :]                       # (1, S, D)
    x = (tok + pos).reshape(B * S, D)     # embedding dropout = identity (eval)

    x = transformer_stack(x, params, batch=B, seq=S, num_heads=num_heads)
    logits = lm_head(x, params["w_out"])
    return logits.reshape(B, S, -1)


# ------------------------------ parameter init --------------------------------

def init_params(key, vocab, D, L, H, F, max_seq):
    # Matches the PyTorch module layout: in_proj (fused QKV) stored transposed
    # as (D, 3D); out_proj/FFN weights transposed to (in, out); matmul weights
    # stored bf16, biases / LN params / embeddings f32.
    std = 0.02
    ks = jax.random.split(key, 7)

    def rnd(k, shape):
        return jax.random.normal(k, shape, jnp.float32) * std

    return {
        "tok_emb": rnd(ks[0], (vocab, D)),
        "pos_emb": rnd(ks[1], (max_seq, D)),
        "w_out": rnd(ks[2], (D, vocab)).astype(jnp.bfloat16),
        "final_ln_g": jnp.ones((D,), jnp.float32),
        "final_ln_b": jnp.zeros((D,), jnp.float32),
        "wqkv": rnd(ks[3], (L, D, 3 * D)).astype(jnp.bfloat16),
        "bqkv": jnp.zeros((L, 3 * D), jnp.float32),
        "wo": rnd(ks[4], (L, D, D)).astype(jnp.bfloat16),
        "bo": jnp.zeros((L, D), jnp.float32),
        "ln1g": jnp.ones((L, D), jnp.float32),
        "ln1b": jnp.zeros((L, D), jnp.float32),
        "w1": rnd(ks[5], (L, D, F)).astype(jnp.bfloat16),
        "b1": jnp.zeros((L, F), jnp.float32),
        "w2": rnd(ks[6], (L, F, D)).astype(jnp.bfloat16),
        "b2": jnp.zeros((L, D), jnp.float32),
        "ln2g": jnp.ones((L, D), jnp.float32),
        "ln2b": jnp.zeros((L, D), jnp.float32),
    }


# ------------------------------ pure-JAX reference -----------------------------

def reference_forward(params, input_ids, num_heads):
    B, S = input_ids.shape
    D = params["tok_emb"].shape[1]
    H = num_heads
    Dh = D // H
    f32 = jnp.float32

    x = jnp.take(params["tok_emb"], input_ids, axis=0) + params["pos_emb"][:S][None]
    causal = jnp.tril(jnp.ones((S, S), bool))

    def ln(v, g, b, eps=1e-5):
        mu = v.mean(-1, keepdims=True)
        var = ((v - mu) ** 2).mean(-1, keepdims=True)
        return (v - mu) / jnp.sqrt(var + eps) * g + b

    L = params["wqkv"].shape[0]
    for l in range(L):
        wqkv = params["wqkv"][l].astype(f32)
        wo = params["wo"][l].astype(f32)
        w1 = params["w1"][l].astype(f32)
        w2 = params["w2"][l].astype(f32)

        qkv = x @ wqkv + params["bqkv"][l]
        q = qkv[..., :D].reshape(B, S, H, Dh)
        k = qkv[..., D:2 * D].reshape(B, S, H, Dh)
        v = qkv[..., 2 * D:].reshape(B, S, H, Dh)
        s = jnp.einsum("bqhd,bkhd->bhqk", q, k) / math.sqrt(Dh)
        s = jnp.where(causal[None, None], s, -1e30)
        w = jax.nn.softmax(s, axis=-1)
        ctx = jnp.einsum("bhqk,bkhd->bqhd", w, v).reshape(B, S, D)
        attn = ctx @ wo + params["bo"][l]
        x = ln(x + attn, params["ln1g"][l], params["ln1b"][l])

        ff = jax.nn.gelu(x @ w1 + params["b1"][l], approximate=False) @ w2 + params["b2"][l]
        x = ln(x + ff, params["ln2g"][l], params["ln2b"][l])

    x = ln(x, params["final_ln_g"], params["final_ln_b"])
    return x @ params["w_out"].astype(f32)


# ----------------------------------- main --------------------------------------

if __name__ == "__main__":
    vocab_size = 64
    model_dim = 32
    num_layers = 2
    num_heads = 4
    dim_ff = model_dim * 2
    max_seq_len = 16
    batch, seq = 2, 8

    key = jax.random.PRNGKey(0)
    pkey, ikey = jax.random.split(key)
    params = init_params(pkey, vocab_size, model_dim, num_layers, num_heads,
                         dim_ff, max_seq_len)
    input_ids = jax.random.randint(ikey, (batch, seq), 0, vocab_size, jnp.int32)

    logits = gpt_forward(params, input_ids, num_heads)
    logits = jax.block_until_ready(logits)
    assert logits.shape == (batch, seq, vocab_size)

    ref = reference_forward(params, input_ids, num_heads)
    err = float(jnp.max(jnp.abs(logits - ref)))
    # bf16 matmul operands + approx softmax reciprocal vs f32 reference.
    assert err < 1e-2, f"max abs err vs reference: {err}"

    print("KERNEL_OK")
</pallas_src>

<mosaic_0001>
module attributes {stable_mosaic.version = 11 : i64} {
  func.func @transformer_stack_kernel(%arg0: i32, %arg1: i32, %arg2: memref<16x32xf32, #tpu.memory_space<vmem>>, %arg3: memref<1x32x96xbf16, #tpu.memory_space<vmem>>, %arg4: memref<1x1x96xf32, #tpu.memory_space<vmem>>, %arg5: memref<1x32x32xbf16, #tpu.memory_space<vmem>>, %arg6: memref<1x32x64xbf16, #tpu.memory_space<vmem>>, %arg7: memref<1x1x64xf32, #tpu.memory_space<vmem>>, %arg8: memref<1x64x32xbf16, #tpu.memory_space<vmem>>, %arg9: memref<1x6x32xf32, #tpu.memory_space<vmem>>, %arg10: memref<2x32xf32, #tpu.memory_space<vmem>>, %arg11: memref<16x32xf32, #tpu.memory_space<vmem>>) attributes {dimension_semantics = [#tpu.dimension_semantics<parallel>, #tpu.dimension_semantics<arbitrary>], iteration_bounds = array<i64: 1, 2>, scalar_prefetch = 0 : i64, scratch_operands = 0 : i64, tpu.core_type = #tpu.core_type<tc>, window_params = [{transform_indices = @transform_0, window_bounds = array<i64: 16, 32>}, {transform_indices = @transform_1, window_bounds = array<i64: 1, 32, 96>}, {transform_indices = @transform_2, window_bounds = array<i64: 1, 1, 96>}, {transform_indices = @transform_3, window_bounds = array<i64: 1, 32, 32>}, {transform_indices = @transform_4, window_bounds = array<i64: 1, 32, 64>}, {transform_indices = @transform_5, window_bounds = array<i64: 1, 1, 64>}, {transform_indices = @transform_6, window_bounds = array<i64: 1, 64, 32>}, {transform_indices = @transform_7, window_bounds = array<i64: 1, 6, 32>}, {pipeline_mode = #tpu.pipeline_mode<synchronous>, transform_indices = @transform_8, window_bounds = array<i64: 2, 32>}, {transform_indices = @transform_9, window_bounds = array<i64: 16, 32>}]} {
    %c0_i32 = arith.constant 0 : i32
    %0 = arith.cmpi eq, %arg1, %c0_i32 : i32
    %1 = arith.extui %0 : i1 to i32
    %c0_i32_0 = arith.constant 0 : i32
    %2 = arith.cmpi ne, %1, %c0_i32_0 : i32
    scf.if %2 {
      %c0_76 = arith.constant 0 : index
      %c0_77 = arith.constant 0 : index
      %235 = vector.load %arg2[%c0_76, %c0_77] : memref<16x32xf32, #tpu.memory_space<vmem>>, vector<16x32xf32>
      %c0_78 = arith.constant 0 : index
      %c0_79 = arith.constant 0 : index
      %236 = vector.load %arg11[%c0_78, %c0_79] : memref<16x32xf32, #tpu.memory_space<vmem>>, vector<16x32xf32>
      tpu.vector_store %arg11[%c0_78, %c0_79], %235 {strides = array<i32>} : memref<16x32xf32, #tpu.memory_space<vmem>>, vector<16x32xf32>,
    } else {
    }
    %c0 = arith.constant 0 : index
    %c0_1 = arith.constant 0 : index
    %3 = vector.load %arg11[%c0, %c0_1] : memref<16x32xf32, #tpu.memory_space<vmem>>, vector<16x32xf32>
    %4 = arith.truncf %3 : vector<16x32xf32> to vector<16x32xbf16>
    %c0_2 = arith.constant 0 : index
    %c0_3 = arith.constant 0 : index
    %c0_4 = arith.constant 0 : index
    %5 = vector.load %arg3[%c0_2, %c0_3, %c0_4] : memref<1x32x96xbf16, #tpu.memory_space<vmem>>, vector<1x32x96xbf16>
    %6 = vector.shape_cast %5 : vector<1x32x96xbf16> to vector<32x96xbf16>
    %cst = arith.constant dense<0.000000e+00> : vector<16x96xf32>
    %7 = tpu.matmul %4, %6, %cst {dimension_numbers = #tpu.dot_dimension_numbers<[1], [0], [0], [1], [0, 0, 1, 1], [], []>} : vector<16x32xbf16>, vector<32x96xbf16>, vector<16x96xf32> -> vector<16x96xf32>
    %c0_5 = arith.constant 0 : index
    %c0_6 = arith.constant 0 : index
    %c0_7 = arith.constant 0 : index
    %8 = vector.load %arg4[%c0_5, %c0_6, %c0_7] : memref<1x1x96xf32, #tpu.memory_space<vmem>>, vector<1x1x96xf32>
    %9 = vector.shape_cast %8 : vector<1x1x96xf32> to vector<1x96xf32>
    %10 = vector.broadcast %9 : vector<1x96xf32> to vector<16x96xf32>
    %11 = arith.addf %7, %10 : vector<16x96xf32>
    %12 = arith.truncf %11 : vector<16x96xf32> to vector<16x96xbf16>
    %13 = tpu.iota {dimensions = array<i32: 0>} : vector<8x8xi32>
    %14 = tpu.iota {dimensions = array<i32: 1>} : vector<8x8xi32>
    %15 = arith.cmpi sle, %14, %13 : vector<8x8xi32>
    %cst_8 = arith.constant 0.000000e+00 : f32
    %cst_9 = arith.constant -1.000000e+30 : f32
    %16 = vector.broadcast %cst_8 : f32 to vector<8x8xf32>
    %17 = vector.broadcast %cst_9 : f32 to vector<8x8xf32>
    %18 = arith.select %15, %16, %17 : vector<8x8xi1>, vector<8x8xf32>
    %19 = vector.extract_strided_slice %12 {offsets = [0, 0], sizes = [16, 8], strides = [1, 1]} : vector<16x96xbf16> to vector<16x8xbf16>
    %20 = vector.shape_cast %19 : vector<16x8xbf16> to vector<2x8x8xbf16>
    %21 = vector.extract_strided_slice %12 {offsets = [0, 32], sizes = [16, 8], strides = [1, 1]} : vector<16x96xbf16> to vector<16x8xbf16>
    %22 = vector.shape_cast %21 : vector<16x8xbf16> to vector<2x8x8xbf16>
    %23 = vector.extract_strided_slice %12 {offsets = [0, 64], sizes = [16, 8], strides = [1, 1]} : vector<16x96xbf16> to vector<16x8xbf16>
    %24 = vector.shape_cast %23 : vector<16x8xbf16> to vector<2x8x8xbf16>
    "tpu.trace_start"() <{level = 10 : i32, message = "bqd,bkd->bqk"}> : () -> ()
    %cst_10 = arith.constant dense<0.000000e+00> : vector<2x8x8xf32>
    %25 = tpu.matmul %20, %22, %cst_10 {dimension_numbers = #tpu.dot_dimension_numbers<[2], [2], [1], [1], [0, 0, 0, 1, 1, 1], [0], [0]>} : vector<2x8x8xbf16>, vector<2x8x8xbf16>, vector<2x8x8xf32> -> vector<2x8x8xf32>
    "tpu.trace_stop"() : () -> ()
    %cst_11 = arith.constant 0.353553385 : f32
    %26 = vector.broadcast %cst_11 : f32 to vector<2x8x8xf32>
    %27 = arith.mulf %25, %26 : vector<2x8x8xf32>
    %28 = vector.shape_cast %18 : vector<8x8xf32> to vector<1x8x8xf32>
    %29 = vector.broadcast %28 : vector<1x8x8xf32> to vector<2x8x8xf32>
    %30 = arith.addf %27, %29 : vector<2x8x8xf32>
    %cst_12 = arith.constant dense<0xFF800000> : vector<2x8xf32>
    %31 = vector.multi_reduction <maximumf>, %30, %cst_12 [2] : vector<2x8x8xf32> to vector<2x8xf32>
    %32 = vector.shape_cast %31 : vector<2x8xf32> to vector<2x8x1xf32>
    %33 = vector.broadcast %32 : vector<2x8x1xf32> to vector<2x8x8xf32>
    %34 = arith.subf %30, %33 : vector<2x8x8xf32>
    %35 = math.exp %34 : vector<2x8x8xf32>
    %cst_13 = arith.constant dense<0.000000e+00> : vector<2x8xf32>
    %36 = vector.multi_reduction <add>, %35, %cst_13 [2] : vector<2x8x8xf32> to vector<2x8xf32>
    %37 = vector.shape_cast %36 : vector<2x8xf32> to vector<2x8x1xf32>
    %38 = tpu.reciprocal %37 {approx = true} : vector<2x8x1xf32> -> vector<2x8x1xf32>
    %39 = vector.broadcast %38 : vector<2x8x1xf32> to vector<2x8x8xf32>
    %40 = arith.mulf %35, %39 : vector<2x8x8xf32>
    %41 = arith.truncf %40 : vector<2x8x8xf32> to vector<2x8x8xbf16>
    "tpu.trace_start"() <{level = 10 : i32, message = "bqk,bkd->bqd"}> : () -> ()
    %cst_14 = arith.constant dense<0.000000e+00> : vector<2x8x8xf32>
    %42 = tpu.matmul %41, %24, %cst_14 {dimension_numbers = #tpu.dot_dimension_numbers<[2], [1], [1], [2], [0, 0, 0, 1, 1, 2], [0], [0]>} : vector<2x8x8xbf16>, vector<2x8x8xbf16>, vector<2x8x8xf32> -> vector<2x8x8xf32>
    "tpu.trace_stop"() : () -> ()
    %43 = vector.extract_strided_slice %12 {offsets = [0, 8], sizes = [16, 8], strides = [1, 1]} : vector<16x96xbf16> to vector<16x8xbf16>
    %44 = vector.shape_cast %43 : vector<16x8xbf16> to vector<2x8x8xbf16>
    %45 = vector.extract_strided_slice %12 {offsets = [0, 40], sizes = [16, 8], strides = [1, 1]} : vector<16x96xbf16> to vector<16x8xbf16>
    %46 = vector.shape_cast %45 : vector<16x8xbf16> to vector<2x8x8xbf16>
    %47 = vector.extract_strided_slice %12 {offsets = [0, 72], sizes = [16, 8], strides = [1, 1]} : vector<16x96xbf16> to vector<16x8xbf16>
    %48 = vector.shape_cast %47 : vector<16x8xbf16> to vector<2x8x8xbf16>
    "tpu.trace_start"() <{level = 10 : i32, message = "bqd,bkd->bqk"}> : () -> ()
    %cst_15 = arith.constant dense<0.000000e+00> : vector<2x8x8xf32>
    %49 = tpu.matmul %44, %46, %cst_15 {dimension_numbers = #tpu.dot_dimension_numbers<[2], [2], [1], [1], [0, 0, 0, 1, 1, 1], [0], [0]>} : vector<2x8x8xbf16>, vector<2x8x8xbf16>, vector<2x8x8xf32> -> vector<2x8x8xf32>
    "tpu.trace_stop"() : () -> ()
    %cst_16 = arith.constant 0.353553385 : f32
    %50 = vector.broadcast %cst_16 : f32 to vector<2x8x8xf32>
    %51 = arith.mulf %49, %50 : vector<2x8x8xf32>
    %52 = vector.shape_cast %18 : vector<8x8xf32> to vector<1x8x8xf32>
    %53 = vector.broadcast %52 : vector<1x8x8xf32> to vector<2x8x8xf32>
    %54 = arith.addf %51, %53 : vector<2x8x8xf32>
    %cst_17 = arith.constant dense<0xFF800000> : vector<2x8xf32>
    %55 = vector.multi_reduction <maximumf>, %54, %cst_17 [2] : vector<2x8x8xf32> to vector<2x8xf32>
    %56 = vector.shape_cast %55 : vector<2x8xf32> to vector<2x8x1xf32>
    %57 = vector.broadcast %56 : vector<2x8x1xf32> to vector<2x8x8xf32>
    %58 = arith.subf %54, %57 : vector<2x8x8xf32>
    %59 = math.exp %58 : vector<2x8x8xf32>
    %cst_18 = arith.constant dense<0.000000e+00> : vector<2x8xf32>
    %60 = vector.multi_reduction <add>, %59, %cst_18 [2] : vector<2x8x8xf32> to vector<2x8xf32>
    %61 = vector.shape_cast %60 : vector<2x8xf32> to vector<2x8x1xf32>
    %62 = tpu.reciprocal %61 {approx = true} : vector<2x8x1xf32> -> vector<2x8x1xf32>
    %63 = vector.broadcast %62 : vector<2x8x1xf32> to vector<2x8x8xf32>
    %64 = arith.mulf %59, %63 : vector<2x8x8xf32>
    %65 = arith.truncf %64 : vector<2x8x8xf32> to vector<2x8x8xbf16>
    "tpu.trace_start"() <{level = 10 : i32, message = "bqk,bkd->bqd"}> : () -> ()
    %cst_19 = arith.constant dense<0.000000e+00> : vector<2x8x8xf32>
    %66 = tpu.matmul %65, %48, %cst_19 {dimension_numbers = #tpu.dot_dimension_numbers<[2], [1], [1], [2], [0, 0, 0, 1, 1, 2], [0], [0]>} : vector<2x8x8xbf16>, vector<2x8x8xbf16>, vector<2x8x8xf32> -> vector<2x8x8xf32>
    "tpu.trace_stop"() : () -> ()
    %67 = vector.extract_strided_slice %12 {offsets = [0, 16], sizes = [16, 8], strides = [1, 1]} : vector<16x96xbf16> to vector<16x8xbf16>
    %68 = vector.shape_cast %67 : vector<16x8xbf16> to vector<2x8x8xbf16>
    %69 = vector.extract_strided_slice %12 {offsets = [0, 48], sizes = [16, 8], strides = [1, 1]} : vector<16x96xbf16> to vector<16x8xbf16>
    %70 = vector.shape_cast %69 : vector<16x8xbf16> to vector<2x8x8xbf16>
    %71 = vector.extract_strided_slice %12 {offsets = [0, 80], sizes = [16, 8], strides = [1, 1]} : vector<16x96xbf16> to vector<16x8xbf16>
    %72 = vector.shape_cast %71 : vector<16x8xbf16> to vector<2x8x8xbf16>
    "tpu.trace_start"() <{level = 10 : i32, message = "bqd,bkd->bqk"}> : () -> ()
    %cst_20 = arith.constant dense<0.000000e+00> : vector<2x8x8xf32>
    %73 = tpu.matmul %68, %70, %cst_20 {dimension_numbers = #tpu.dot_dimension_numbers<[2], [2], [1], [1], [0, 0, 0, 1, 1, 1], [0], [0]>} : vector<2x8x8xbf16>, vector<2x8x8xbf16>, vector<2x8x8xf32> -> vector<2x8x8xf32>
    "tpu.trace_stop"() : () -> ()
    %cst_21 = arith.constant 0.353553385 : f32
    %74 = vector.broadcast %cst_21 : f32 to vector<2x8x8xf32>
    %75 = arith.mulf %73, %74 : vector<2x8x8xf32>
    %76 = vector.shape_cast %18 : vector<8x8xf32> to vector<1x8x8xf32>
    %77 = vector.broadcast %76 : vector<1x8x8xf32> to vector<2x8x8xf32>
    %78 = arith.addf %75, %77 : vector<2x8x8xf32>
    %cst_22 = arith.constant dense<0xFF800000> : vector<2x8xf32>
    %79 = vector.multi_reduction <maximumf>, %78, %cst_22 [2] : vector<2x8x8xf32> to vector<2x8xf32>
    %80 = vector.shape_cast %79 : vector<2x8xf32> to vector<2x8x1xf32>
    %81 = vector.broadcast %80 : vector<2x8x1xf32> to vector<2x8x8xf32>
    %82 = arith.subf %78, %81 : vector<2x8x8xf32>
    %83 = math.exp %82 : vector<2x8x8xf32>
    %cst_23 = arith.constant dense<0.000000e+00> : vector<2x8xf32>
    %84 = vector.multi_reduction <add>, %83, %cst_23 [2] : vector<2x8x8xf32> to vector<2x8xf32>
    %85 = vector.shape_cast %84 : vector<2x8xf32> to vector<2x8x1xf32>
    %86 = tpu.reciprocal %85 {approx = true} : vector<2x8x1xf32> -> vector<2x8x1xf32>
    %87 = vector.broadcast %86 : vector<2x8x1xf32> to vector<2x8x8xf32>
    %88 = arith.mulf %83, %87 : vector<2x8x8xf32>
    %89 = arith.truncf %88 : vector<2x8x8xf32> to vector<2x8x8xbf16>
    "tpu.trace_start"() <{level = 10 : i32, message = "bqk,bkd->bqd"}> : () -> ()
    %cst_24 = arith.constant dense<0.000000e+00> : vector<2x8x8xf32>
    %90 = tpu.matmul %89, %72, %cst_24 {dimension_numbers = #tpu.dot_dimension_numbers<[2], [1], [1], [2], [0, 0, 0, 1, 1, 2], [0], [0]>} : vector<2x8x8xbf16>, vector<2x8x8xbf16>, vector<2x8x8xf32> -> vector<2x8x8xf32>
    "tpu.trace_stop"() : () -> ()
    %91 = vector.extract_strided_slice %12 {offsets = [0, 24], sizes = [16, 8], strides = [1, 1]} : vector<16x96xbf16> to vector<16x8xbf16>
    %92 = vector.shape_cast %91 : vector<16x8xbf16> to vector<2x8x8xbf16>
    %93 = vector.extract_strided_slice %12 {offsets = [0, 56], sizes = [16, 8], strides = [1, 1]} : vector<16x96xbf16> to vector<16x8xbf16>
    %94 = vector.shape_cast %93 : vector<16x8xbf16> to vector<2x8x8xbf16>
    %95 = vector.extract_strided_slice %12 {offsets = [0, 88], sizes = [16, 8], strides = [1, 1]} : vector<16x96xbf16> to vector<16x8xbf16>
    %96 = vector.shape_cast %95 : vector<16x8xbf16> to vector<2x8x8xbf16>
    "tpu.trace_start"() <{level = 10 : i32, message = "bqd,bkd->bqk"}> : () -> ()
    %cst_25 = arith.constant dense<0.000000e+00> : vector<2x8x8xf32>
    %97 = tpu.matmul %92, %94, %cst_25 {dimension_numbers = #tpu.dot_dimension_numbers<[2], [2], [1], [1], [0, 0, 0, 1, 1, 1], [0], [0]>} : vector<2x8x8xbf16>, vector<2x8x8xbf16>, vector<2x8x8xf32> -> vector<2x8x8xf32>
    "tpu.trace_stop"() : () -> ()
    %cst_26 = arith.constant 0.353553385 : f32
    %98 = vector.broadcast %cst_26 : f32 to vector<2x8x8xf32>
    %99 = arith.mulf %97, %98 : vector<2x8x8xf32>
    %100 = vector.shape_cast %18 : vector<8x8xf32> to vector<1x8x8xf32>
    %101 = vector.broadcast %100 : vector<1x8x8xf32> to vector<2x8x8xf32>
    %102 = arith.addf %99, %101 : vector<2x8x8xf32>
    %cst_27 = arith.constant dense<0xFF800000> : vector<2x8xf32>
    %103 = vector.multi_reduction <maximumf>, %102, %cst_27 [2] : vector<2x8x8xf32> to vector<2x8xf32>
    %104 = vector.shape_cast %103 : vector<2x8xf32> to vector<2x8x1xf32>
    %105 = vector.broadcast %104 : vector<2x8x1xf32> to vector<2x8x8xf32>
    %106 = arith.subf %102, %105 : vector<2x8x8xf32>
    %107 = math.exp %106 : vector<2x8x8xf32>
    %cst_28 = arith.constant dense<0.000000e+00> : vector<2x8xf32>
    %108 = vector.multi_reduction <add>, %107, %cst_28 [2] : vector<2x8x8xf32> to vector<2x8xf32>
    %109 = vector.shape_cast %108 : vector<2x8xf32> to vector<2x8x1xf32>
    %110 = tpu.reciprocal %109 {approx = true} : vector<2x8x1xf32> -> vector<2x8x1xf32>
    %111 = vector.broadcast %110 : vector<2x8x1xf32> to vector<2x8x8xf32>
    %112 = arith.mulf %107, %111 : vector<2x8x8xf32>
    %113 = arith.truncf %112 : vector<2x8x8xf32> to vector<2x8x8xbf16>
    "tpu.trace_start"() <{level = 10 : i32, message = "bqk,bkd->bqd"}> : () -> ()
    %cst_29 = arith.constant dense<0.000000e+00> : vector<2x8x8xf32>
    %114 = tpu.matmul %113, %96, %cst_29 {dimension_numbers = #tpu.dot_dimension_numbers<[2], [1], [1], [2], [0, 0, 0, 1, 1, 2], [0], [0]>} : vector<2x8x8xbf16>, vector<2x8x8xbf16>, vector<2x8x8xf32> -> vector<2x8x8xf32>
    "tpu.trace_stop"() : () -> ()
    %115 = tpu.concatenate %42, %66, %90, %114 in 2 : vector<2x8x8xf32>, vector<2x8x8xf32>, vector<2x8x8xf32>, vector<2x8x8xf32> -> vector<2x8x32xf32>
    %116 = vector.shape_cast %115 : vector<2x8x32xf32> to vector<16x32xf32>
    %c0_30 = arith.constant 0 : index
    %c0_31 = arith.constant 0 : index
    %c0_32 = arith.constant 0 : index
    %117 = vector.load %arg9[%c0_30, %c0_31, %c0_32] : memref<1x6x32xf32, #tpu.memory_space<vmem>>, vector<1x6x32xf32>
    %118 = vector.shape_cast %117 : vector<1x6x32xf32> to vector<6x32xf32>
    %119 = vector.extract_strided_slice %118 {offsets = [0, 0], sizes = [1, 32], strides = [1, 1]} : vector<6x32xf32> to vector<1x32xf32>
    %120 = vector.extract_strided_slice %118 {offsets = [1, 0], sizes = [1, 32], strides = [1, 1]} : vector<6x32xf32> to vector<1x32xf32>
    %121 = vector.extract_strided_slice %118 {offsets = [2, 0], sizes = [1, 32], strides = [1, 1]} : vector<6x32xf32> to vector<1x32xf32>
    %122 = vector.extract_strided_slice %118 {offsets = [3, 0], sizes = [1, 32], strides = [1, 1]} : vector<6x32xf32> to vector<1x32xf32>
    %123 = vector.extract_strided_slice %118 {offsets = [4, 0], sizes = [1, 32], strides = [1, 1]} : vector<6x32xf32> to vector<1x32xf32>
    %124 = vector.extract_strided_slice %118 {offsets = [5, 0], sizes = [1, 32], strides = [1, 1]} : vector<6x32xf32> to vector<1x32xf32>
    %125 = arith.truncf %116 : vector<16x32xf32> to vector<16x32xbf16>
    %c0_33 = arith.constant 0 : index
    %c0_34 = arith.constant 0 : index
    %c0_35 = arith.constant 0 : index
    %126 = vector.load %arg5[%c0_33, %c0_34, %c0_35] : memref<1x32x32xbf16, #tpu.memory_space<vmem>>, vector<1x32x32xbf16>
    %127 = vector.shape_cast %126 : vector<1x32x32xbf16> to vector<32x32xbf16>
    %cst_36 = arith.constant dense<0.000000e+00> : vector<16x32xf32>
    %128 = tpu.matmul %125, %127, %cst_36 {dimension_numbers = #tpu.dot_dimension_numbers<[1], [0], [0], [1], [0, 0, 1, 1], [], []>} : vector<16x32xbf16>, vector<32x32xbf16>, vector<16x32xf32> -> vector<16x32xf32>
    %129 = vector.broadcast %119 : vector<1x32xf32> to vector<16x32xf32>
    %130 = arith.addf %128, %129 : vector<16x32xf32>
    %131 = arith.addf %3, %130 : vector<16x32xf32>
    %cst_37 = arith.constant dense<0.000000e+00> : vector<16xf32>
    %132 = vector.multi_reduction <add>, %131, %cst_37 [1] : vector<16x32xf32> to vector<16xf32>
    %133 = vector.shape_cast %132 : vector<16xf32> to vector<16x1xf32>
    %cst_38 = arith.constant 3.200000e+01 : f32
    %134 = vector.broadcast %cst_38 : f32 to vector<16x1xf32>
    %135 = arith.divf %133, %134 : vector<16x1xf32>
    %136 = vector.broadcast %135 : vector<16x1xf32> to vector<16x32xf32>
    %137 = arith.subf %131, %136 : vector<16x32xf32>
    %138 = arith.mulf %137, %137 : vector<16x32xf32>
    %cst_39 = arith.constant dense<0.000000e+00> : vector<16xf32>
    %139 = vector.multi_reduction <add>, %138, %cst_39 [1] : vector<16x32xf32> to vector<16xf32>
    %140 = vector.shape_cast %139 : vector<16xf32> to vector<16x1xf32>
    %cst_40 = arith.constant 3.200000e+01 : f32
    %141 = vector.broadcast %cst_40 : f32 to vector<16x1xf32>
    %142 = arith.divf %140, %141 : vector<16x1xf32>
    %143 = vector.broadcast %135 : vector<16x1xf32> to vector<16x32xf32>
    %144 = arith.subf %131, %143 : vector<16x32xf32>
    %cst_41 = arith.constant 9.99999974E-6 : f32
    %145 = vector.broadcast %cst_41 : f32 to vector<16x1xf32>
    %146 = arith.addf %142, %145 : vector<16x1xf32>
    %147 = math.rsqrt %146 : vector<16x1xf32>
    %148 = vector.broadcast %147 : vector<16x1xf32> to vector<16x32xf32>
    %149 = arith.mulf %144, %148 : vector<16x32xf32>
    %150 = vector.broadcast %120 : vector<1x32xf32> to vector<16x32xf32>
    %151 = arith.mulf %149, %150 : vector<16x32xf32>
    %152 = vector.broadcast %121 : vector<1x32xf32> to vector<16x32xf32>
    %153 = arith.addf %151, %152 : vector<16x32xf32>
    %154 = arith.truncf %153 : vector<16x32xf32> to vector<16x32xbf16>
    %c0_42 = arith.constant 0 : index
    %c0_43 = arith.constant 0 : index
    %c0_44 = arith.constant 0 : index
    %155 = vector.load %arg6[%c0_42, %c0_43, %c0_44] : memref<1x32x64xbf16, #tpu.memory_space<vmem>>, vector<1x32x64xbf16>
    %156 = vector.shape_cast %155 : vector<1x32x64xbf16> to vector<32x64xbf16>
    %cst_45 = arith.constant dense<0.000000e+00> : vector<16x64xf32>
    %157 = tpu.matmul %154, %156, %cst_45 {dimension_numbers = #tpu.dot_dimension_numbers<[1], [0], [0], [1], [0, 0, 1, 1], [], []>} : vector<16x32xbf16>, vector<32x64xbf16>, vector<16x64xf32> -> vector<16x64xf32>
    %c0_46 = arith.constant 0 : index
    %c0_47 = arith.constant 0 : index
    %c0_48 = arith.constant 0 : index
    %158 = vector.load %arg7[%c0_46, %c0_47, %c0_48] : memref<1x1x64xf32, #tpu.memory_space<vmem>>, vector<1x1x64xf32>
    %159 = vector.shape_cast %158 : vector<1x1x64xf32> to vector<1x64xf32>
    %160 = vector.broadcast %159 : vector<1x64xf32> to vector<16x64xf32>
    %161 = arith.addf %157, %160 : vector<16x64xf32>
    %cst_49 = arith.constant 5.000000e-01 : f32
    %162 = vector.broadcast %cst_49 : f32 to vector<16x64xf32>
    %163 = arith.mulf %162, %161 : vector<16x64xf32>
    %cst_50 = arith.constant 0.707106769 : f32
    %164 = vector.broadcast %cst_50 : f32 to vector<16x64xf32>
    %165 = arith.mulf %161, %164 : vector<16x64xf32>
    %166 = math.absf %165 : vector<16x64xf32>
    %cst_51 = arith.constant 0.327591091 : f32
    %167 = vector.broadcast %cst_51 : f32 to vector<16x64xf32>
    %168 = arith.mulf %167, %166 : vector<16x64xf32>
    %cst_52 = arith.constant 1.000000e+00 : f32
    %169 = vector.broadcast %cst_52 : f32 to vector<16x64xf32>
    %170 = arith.addf %169, %168 : vector<16x64xf32>
    %cst_53 = arith.constant 1.000000e+00 : f32
    %171 = vector.broadcast %cst_53 : f32 to vector<16x64xf32>
    %172 = arith.divf %171, %170 : vector<16x64xf32>
    %cst_54 = arith.constant 1.06140542 : f32
    %173 = vector.broadcast %cst_54 : f32 to vector<16x64xf32>
    %174 = arith.mulf %173, %172 : vector<16x64xf32>
    %cst_55 = arith.constant -1.45315206 : f32
    %175 = vector.broadcast %cst_55 : f32 to vector<16x64xf32>
    %176 = arith.addf %174, %175 : vector<16x64xf32>
    %177 = arith.mulf %176, %172 : vector<16x64xf32>
    %cst_56 = arith.constant 1.42141378 : f32
    %178 = vector.broadcast %cst_56 : f32 to vector<16x64xf32>
    %179 = arith.addf %177, %178 : vector<16x64xf32>
    %180 = arith.mulf %179, %172 : vector<16x64xf32>
    %cst_57 = arith.constant -0.284496725 : f32
    %181 = vector.broadcast %cst_57 : f32 to vector<16x64xf32>
    %182 = arith.addf %180, %181 : vector<16x64xf32>
    %183 = arith.mulf %182, %172 : vector<16x64xf32>
    %cst_58 = arith.constant 0.254829586 : f32
    %184 = vector.broadcast %cst_58 : f32 to vector<16x64xf32>
    %185 = arith.addf %183, %184 : vector<16x64xf32>
    %186 = arith.mulf %185, %172 : vector<16x64xf32>
    %cst_59 = arith.constant 0.000000e+00 : f32
    %187 = vector.broadcast %cst_59 : f32 to vector<16x64xf32>
    %188 = arith.subf %187, %166 : vector<16x64xf32>
    %189 = arith.mulf %188, %166 : vector<16x64xf32>
    %190 = math.exp %189 : vector<16x64xf32>
    %191 = arith.mulf %186, %190 : vector<16x64xf32>
    %cst_60 = arith.constant 1.000000e+00 : f32
    %192 = vector.broadcast %cst_60 : f32 to vector<16x64xf32>
    %193 = arith.subf %192, %191 : vector<16x64xf32>
    %cst_61 = arith.constant 0.000000e+00 : f32
    %194 = vector.broadcast %cst_61 : f32 to vector<16x64xf32>
    %195 = arith.cmpf oge, %165, %194 : vector<16x64xf32>
    %cst_62 = arith.constant 0.000000e+00 : f32
    %196 = vector.broadcast %cst_62 : f32 to vector<16x64xf32>
    %197 = arith.subf %196, %193 : vector<16x64xf32>
    %198 = arith.select %195, %193, %197 : vector<16x64xi1>, vector<16x64xf32>
    %cst_63 = arith.constant 1.000000e+00 : f32
    %199 = vector.broadcast %cst_63 : f32 to vector<16x64xf32>
    %200 = arith.addf %199, %198 : vector<16x64xf32>
    %201 = arith.mulf %163, %200 : vector<16x64xf32>
    %202 = arith.truncf %201 : vector<16x64xf32> to vector<16x64xbf16>
    %c0_64 = arith.constant 0 : index
    %c0_65 = arith.constant 0 : index
    %c0_66 = arith.constant 0 : index
    %203 = vector.load %arg8[%c0_64, %c0_65, %c0_66] : memref<1x64x32xbf16, #tpu.memory_space<vmem>>, vector<1x64x32xbf16>
    %204 = vector.shape_cast %203 : vector<1x64x32xbf16> to vector<64x32xbf16>
    %cst_67 = arith.constant dense<0.000000e+00> : vector<16x32xf32>
    %205 = tpu.matmul %202, %204, %cst_67 {dimension_numbers = #tpu.dot_dimension_numbers<[1], [0], [0], [1], [0, 0, 1, 1], [], []>} : vector<16x64xbf16>, vector<64x32xbf16>, vector<16x32xf32> -> vector<16x32xf32>
    %206 = vector.broadcast %122 : vector<1x32xf32> to vector<16x32xf32>
    %207 = arith.addf %205, %206 : vector<16x32xf32>
    %208 = arith.addf %153, %207 : vector<16x32xf32>
    %cst_68 = arith.constant dense<0.000000e+00> : vector<16xf32>
    %209 = vector.multi_reduction <add>, %208, %cst_68 [1] : vector<16x32xf32> to vector<16xf32>
    %210 = vector.shape_cast %209 : vector<16xf32> to vector<16x1xf32>
    %cst_69 = arith.constant 3.200000e+01 : f32
    %211 = vector.broadcast %cst_69 : f32 to vector<16x1xf32>
    %212 = arith.divf %210, %211 : vector<16x1xf32>
    %213 = vector.broadcast %212 : vector<16x1xf32> to vector<16x32xf32>
    %214 = arith.subf %208, %213 : vector<16x32xf32>
    %215 = arith.mulf %214, %214 : vector<16x32xf32>
    %cst_70 = arith.constant dense<0.000000e+00> : vector<16xf32>
    %216 = vector.multi_reduction <add>, %215, %cst_70 [1] : vector<16x32xf32> to vector<16xf32>
    %217 = vector.shape_cast %216 : vector<16xf32> to vector<16x1xf32>
    %cst_71 = arith.constant 3.200000e+01 : f32
    %218 = vector.broadcast %cst_71 : f32 to vector<16x1xf32>
    %219 = arith.divf %217, %218 : vector<16x1xf32>
    %220 = vector.broadcast %212 : vector<16x1xf32> to vector<16x32xf32>
    %221 = arith.subf %208, %220 : vector<16x32xf32>
    %cst_72 = arith.constant 9.99999974E-6 : f32
    %222 = vector.broadcast %cst_72 : f32 to vector<16x1xf32>
    %223 = arith.addf %219, %222 : vector<16x1xf32>
    %224 = math.rsqrt %223 : vector<16x1xf32>
    %225 = vector.broadcast %224 : vector<16x1xf32> to vector<16x32xf32>
    %226 = arith.mulf %221, %225 : vector<16x32xf32>
    %227 = vector.broadcast %123 : vector<1x32xf32> to vector<16x32xf32>
    %228 = arith.mulf %226, %227 : vector<16x32xf32>
    %229 = vector.broadcast %124 : vector<1x32xf32> to vector<16x32xf32>
    %230 = arith.addf %228, %229 : vector<16x32xf32>
    %c0_73 = arith.constant 0 : index
    %c0_74 = arith.constant 0 : index
    %231 = vector.load %arg11[%c0_73, %c0_74] : memref<16x32xf32, #tpu.memory_space<vmem>>, vector<16x32xf32>
    tpu.vector_store %arg11[%c0_73, %c0_74], %230 {strides = array<i32>} : memref<16x32xf32, #tpu.memory_space<vmem>>, vector<16x32xf32>,
    %c1_i32 = arith.constant 1 : i32
    %232 = arith.cmpi eq, %arg1, %c1_i32 : i32
    %233 = arith.extui %232 : i1 to i32
    %c0_i32_75 = arith.constant 0 : i32
    %234 = arith.cmpi ne, %233, %c0_i32_75 : i32
    scf.if %234 {
      %c0_76 = arith.constant 0 : index
      %c0_77 = arith.constant 0 : index
      %235 = vector.load %arg10[%c0_76, %c0_77] : memref<2x32xf32, #tpu.memory_space<vmem>>, vector<1x32xf32>
      %c1 = arith.constant 1 : index
      %c0_78 = arith.constant 0 : index
      %236 = vector.load %arg10[%c1, %c0_78] : memref<2x32xf32, #tpu.memory_space<vmem>>, vector<1x32xf32>
      %cst_79 = arith.constant dense<0.000000e+00> : vector<16xf32>
      %237 = vector.multi_reduction <add>, %230, %cst_79 [1] : vector<16x32xf32> to vector<16xf32>
      %238 = vector.shape_cast %237 : vector<16xf32> to vector<16x1xf32>
      %cst_80 = arith.constant 3.200000e+01 : f32
      %239 = vector.broadcast %cst_80 : f32 to vector<16x1xf32>
      %240 = arith.divf %238, %239 : vector<16x1xf32>
      %241 = vector.broadcast %240 : vector<16x1xf32> to vector<16x32xf32>
      %242 = arith.subf %230, %241 : vector<16x32xf32>
      %243 = arith.mulf %242, %242 : vector<16x32xf32>
      %cst_81 = arith.constant dense<0.000000e+00> : vector<16xf32>
      %244 = vector.multi_reduction <add>, %243, %cst_81 [1] : vector<16x32xf32> to vector<16xf32>
      %245 = vector.shape_cast %244 : vector<16xf32> to vector<16x1xf32>
      %cst_82 = arith.constant 3.200000e+01 : f32
      %246 = vector.broadcast %cst_82 : f32 to vector<16x1xf32>
      %247 = arith.divf %245, %246 : vector<16x1xf32>
      %248 = vector.broadcast %240 : vector<16x1xf32> to vector<16x32xf32>
      %249 = arith.subf %230, %248 : vector<16x32xf32>
      %cst_83 = arith.constant 9.99999974E-6 : f32
      %250 = vector.broadcast %cst_83 : f32 to vector<16x1xf32>
      %251 = arith.addf %247, %250 : vector<16x1xf32>
      %252 = math.rsqrt %251 : vector<16x1xf32>
      %253 = vector.broadcast %252 : vector<16x1xf32> to vector<16x32xf32>
      %254 = arith.mulf %249, %253 : vector<16x32xf32>
      %255 = vector.broadcast %235 : vector<1x32xf32> to vector<16x32xf32>
      %256 = arith.mulf %254, %255 : vector<16x32xf32>
      %257 = vector.broadcast %236 : vector<1x32xf32> to vector<16x32xf32>
      %258 = arith.addf %256, %257 : vector<16x32xf32>
      %c0_84 = arith.constant 0 : index
      %c0_85 = arith.constant 0 : index
      %259 = vector.load %arg11[%c0_84, %c0_85] : memref<16x32xf32, #tpu.memory_space<vmem>>, vector<16x32xf32>
      tpu.vector_store %arg11[%c0_84, %c0_85], %258 {strides = array<i32>} : memref<16x32xf32, #tpu.memory_space<vmem>>, vector<16x32xf32>,
    } else {
    }
    return
  }
  func.func @transform_0(%arg0: i32, %arg1: i32) -> (i32, i32) {
    %c0_i32 = arith.constant 0 : i32
    %c0_i32_0 = arith.constant 0 : i32
    return %arg0, %c0_i32 : i32, i32
  }
  func.func @transform_1(%arg0: i32, %arg1: i32) -> (i32, i32, i32) {
    %c0_i32 = arith.constant 0 : i32
    %c0_i32_0 = arith.constant 0 : i32
    %c0_i32_1 = arith.constant 0 : i32
    return %arg1, %c0_i32, %c0_i32_0 : i32, i32, i32
  }
  func.func @transform_2(%arg0: i32, %arg1: i32) -> (i32, i32, i32) {
    %c0_i32 = arith.constant 0 : i32
    %c0_i32_0 = arith.constant 0 : i32
    %c0_i32_1 = arith.constant 0 : i32
    return %arg1, %c0_i32, %c0_i32_0 : i32, i32, i32
  }
  func.func @transform_3(%arg0: i32, %arg1: i32) -> (i32, i32, i32) {
    %c0_i32 = arith.constant 0 : i32
    %c0_i32_0 = arith.constant 0 : i32
    %c0_i32_1 = arith.constant 0 : i32
    return %arg1, %c0_i32, %c0_i32_0 : i32, i32, i32
  }
  func.func @transform_4(%arg0: i32, %arg1: i32) -> (i32, i32, i32) {
    %c0_i32 = arith.constant 0 : i32
    %c0_i32_0 = arith.constant 0 : i32
    %c0_i32_1 = arith.constant 0 : i32
    return %arg1, %c0_i32, %c0_i32_0 : i32, i32, i32
  }
  func.func @transform_5(%arg0: i32, %arg1: i32) -> (i32, i32, i32) {
    %c0_i32 = arith.constant 0 : i32
    %c0_i32_0 = arith.constant 0 : i32
    %c0_i32_1 = arith.constant 0 : i32
    return %arg1, %c0_i32, %c0_i32_0 : i32, i32, i32
  }
  func.func @transform_6(%arg0: i32, %arg1: i32) -> (i32, i32, i32) {
    %c0_i32 = arith.constant 0 : i32
    %c0_i32_0 = arith.constant 0 : i32
    %c0_i32_1 = arith.constant 0 : i32
    return %arg1, %c0_i32, %c0_i32_0 : i32, i32, i32
  }
  func.func @transform_7(%arg0: i32, %arg1: i32) -> (i32, i32, i32) {
    %c0_i32 = arith.constant 0 : i32
    %c0_i32_0 = arith.constant 0 : i32
    %c0_i32_1 = arith.constant 0 : i32
    return %arg1, %c0_i32, %c0_i32_0 : i32, i32, i32
  }
  func.func @transform_8(%arg0: i32, %arg1: i32) -> (i32, i32) {
    %c0_i32 = arith.constant 0 : i32
    %c0_i32_0 = arith.constant 0 : i32
    %c0_i32_1 = arith.constant 0 : i32
    return %c0_i32, %c0_i32_0 : i32, i32
  }
  func.func @transform_9(%arg0: i32, %arg1: i32) -> (i32, i32) {
    %c0_i32 = arith.constant 0 : i32
    %c0_i32_0 = arith.constant 0 : i32
    return %arg0, %c0_i32 : i32, i32
  }
}

</mosaic_0001>

<bundles_post_ra>
// kernel: tpu_custom_call.1
= control target key start
LH: loop header
LB: loop body
LE: loop exit
PB: predicated region body
PF: predicated region fallthrough
CT: control target
= control target key end

     0   :  { %s3074_s0 = inlined_call_operand.vmem [shape: f32[16,32], index: 0, kind: input, shape index: {}]   ;;  %s3075_s1 = inlined_call_operand.vmem [shape: bf16[2,32,96], index: 1, kind: input, shape index: {}]   ;;  %s3076_s2 = inlined_call_operand.vmem [shape: f32[2,1,96], index: 2, kind: input, shape index: {}]   ;;  %s3077_s3 = inlined_call_operand.vmem [shape: bf16[2,32,32], index: 3, kind: input, shape index: {}]   ;;  %s3078_s4 = inlined_call_operand.vmem [shape: bf16[2,32,64], index: 4, kind: input, shape index: {}]   ;;  %s3079_s5 = inlined_call_operand.hbm [shape: f32[2,1,64], index: 5, kind: input, shape index: {}]   ;;  %s3080_s6 = inlined_call_operand.vmem [shape: bf16[2,64,32], index: 6, kind: input, shape index: {}]   ;;  %s3081_s7 = inlined_call_operand.vmem [shape: f32[2,6,32], index: 7, kind: input, shape index: {}]   ;;  %s3082_s8 = inlined_call_operand.vmem [shape: f32[2,32], index: 8, kind: input, shape index: {}]   ;;  %s3083_s9 = inlined_call_operand.hbm [shape: f32[16,32], index: 9, kind: output, shape index: {}]  }
   0x1   :  { %3087 = sst [smem:[#allocation11_spill]] %s3079_s5 }
   0x2   :  { %14 = vsyncpa [#allocation3], 0 }
   0x3   :  { %16 = vsyncpa [#allocation3 + $0x1], 0 }
   0x4   :  { %17 = vsyncpa [#allocation4], 0  ;;  %s2636_s30 = smov 0   ;;  %s2638_s10 = smov 0  }
   0x5   :  { %s2640_s11 = smov 0   ;;  %s2642_s12 = smov 0  }
   0x6   :  { %s2644_s13 = smov 0   ;;  %s2646_s14 = smov 0  }
   0x7 LB: > { %3088 = sst [smem:[#allocation8_spill]] %s2560_s13  ;;  %s3084_s15 = sadd.s32 4294967295, %s2564_s14   ;;  %s2564_s14 = sphi %s2646_s14, %s23_s14   ;;  %s2560_s13 = sphi %s2644_s13, %s3102_s13   ;;  %s2556_s12 = sphi %s2642_s12, %s3106_s12   ;;  %s2552_s11 = sphi %s2640_s11, %s3105_s11   ;;  %s2548_s10 = sphi %s2638_s10, %s3104_s10   ;;  %s2544_s30 = sphi %s2636_s30, %s3103_s30  }
   0x8   : > { %s32_s16 = sadd.s32 1, %s2560_s13  ;;  %s172_s17 = sadd.s32 1, %s2552_s11 }
   0x9   : > { %p33_p0 = scmp.ge.s32.totalorder %s32_s16, 2  ;;  %p179_p1 = scmp.ne.s32.totalorder %s2552_s11, %s2548_s10 }
   0xa   : > { %p180_p2 = scmp.eq.s32.totalorder %s2564_s14, 0  ;;  %p185_p4 = scmp.ne.s32.totalorder %s2548_s10, %s2544_s30 }
   0xb   : > { %s3108_s16 = smov (%p33_p0, %s32_s16), 0  ;;  %p186_p5 = scmp.eq.s32.totalorder %s3084_s15, 0 }
   0xc   : > { %3089 = sst [smem:[#allocation9_spill]] %s3108_s16  ;;  %p2672_p3 = por %p180_p2, %p179_p1 }
   0xd   : > { %s169_s19 = ssub.s32 %s2560_s13, %s3108_s16  ;;  %p2681_p7 = por %p186_p5, %p185_p4 }
   0xe   : > { %p170_p6 = scmp.eq.s32.totalorder %s169_s19, 0  ;;  %p2307_p8 = scmp.lt.s32.totalorder %s2564_s14, 2 }
   0xf   : > { %s350_s22 = sand.u32 1, %s2552_s11   ;;  %s2060_s23 = sshll.u32 %s2560_s13, 4 }
  0x10   : > { %s2687_s21 = scalar_select %p170_p6, %s2552_s11, %s172_s17  }
  0x11   : > { %s3093_s5 = sld [smem:[#allocation11_spill]]  ;;  %s353_s27 = scalar_lea.vmem [#allocation2], %s350_s22 }
  0x12   : > { %3092 = sst [smem:[#allocation10_spill]] %s2687_s21  ;;  %s360_s28 = sshll.u32 %s353_s27, 4  ;;  %s2696_s28 = int_to_ptr.vmem [resolvable:$true] %s360_s28 }
  0x13   : > { %p2700_p9 = pnand %p2307_p8, %p2672_p3  ;;  %s351_s30 = scalar_lea.sflag [#allocation3], %s350_s22 }
  0x15   : > { %p2456_p13 = pneg %p2700_p9 }
  0x17   : > { %s2694_s26 = scalar_lea.hbm %s3093_s5, %s2060_s23  ;;  %s2459_s18 = scalar_lea.hbm %s3093_s5, 32 }
  0x18   : > { %s2454_s17 = scalar_lea.hbm %s2694_s26, 16  ;;  %p2460_p2 = scmp.lt.u32.totalorder %s2694_s26, %s3093_s5 }
  0x19   : > { %p2455_p12 = scmp.ne.s32.totalorder %s2694_s26, %s2454_s17  ;;  %p2461_p3 = scmp.lt.u32.totalorder %s2459_s18, %s2454_s17 }
  0x1a   : > { %p2463_p5 = scmp.lt.u32.totalorder %s2454_s17, %s2694_s26 }
  0x1b   : > { %p2457_p0 = pnand %p2456_p13, %p2455_p12  ;;  %p2462_p4 = por %p2461_p3, %p2460_p2 }
  0x1d   : > { %p2458_p1 = pneg %p2457_p0  ;;  %p2464_p6 = por %p2463_p5, %p2462_p4 }
  0x1f   : > { %p2465_p8 = pnand %p2464_p6, %p2458_p1 }
  0x21   : > { %2468 = shalt.err (!%p2465_p8)
}
  0x22   : > { %s2469_s22 = scalar_lea.vmem %s2696_s28, 16  ;;  %s2566_s27 = smov [#allocation2]  }
  0x23   : > { %p2470_p12 = scmp.ne.s32.totalorder %s2696_s28, %s2469_s22  ;;  %s2474_s19 = sshll.u32 %s2566_s27, 4  ;;  %s2475_s19 = int_to_ptr.vmem [resolvable:$false] %s2474_s19 }
  0x24   : > { %s2476_s23 = scalar_lea.vmem %s2475_s19, 32  ;;  %p2477_p11 = scmp.lt.s32.totalorder %s2696_s28, %s2475_s19 }
  0x25   : > { %p2472_p0 = pnand %p2470_p12, %p2456_p13  ;;  %p2478_p2 = scmp.lt.s32.totalorder %s2476_s23, %s2469_s22 }
  0x27   : > { %p2473_p10 = pneg %p2472_p0  ;;  %p2479_p3 = por %p2478_p2, %p2477_p11 }
  0x29   : > { %p2480_p4 = pnand %p2479_p3, %p2473_p10 }
  0x2b   : > { %2483 = shalt.err (!%p2480_p4)
}
  0x2c   : > { %2306 = dma.hbm_to_vmem [thread:$0]  (!%p2700_p9), %s2694_s26, 16, %s2696_s28, %s351_s30  }
  0x2d   : > { %p3095_p1 = scmp.lt.s32.totalorder %s2564_s14, 3  ;;  %p3096_p5 = scmp.ge.s32.totalorder %s2564_s14, 1 }
  0x2f   : > { %p381_p13 = pnand %p3096_p5, %p3095_p1 }
  0x30   : > { %s386_s17 = sand.u32 (!%p381_p13), 1, %s2548_s10  }
  0x31   : > { %384 = sbr.rel (%p381_p13) target bundleno = 4577 (0x11e1), region = 56  ;;  %s387_s18 = scalar_lea.sflag (!%p381_p13), [#allocation3], %s386_s17 }
  0x32   : > { %s2736_s24 = scalar_lea.vmem (!%p381_p13), [#allocation2], %s386_s17 }
  0x38   : > { %2535 = dma.done.wait (%p2681_p7), %s387_s18, 16  }
  0x39   : > { %2537 = vsyncadd (%p2681_p7), %s387_s18, 4294967280  ;;  %p456_p10 = scmp.lt.s32.totalorder %s2556_s12, 1  ;;  %p2071_p7 = scmp.ne.s32.totalorder %s2556_s12, 0 }
  0x3a   : > { %v489_v0 = vld [vmem:[%s3074_s0] sm:$0xff] (!%p2071_p7)  ;;  %vm491_vm0 = vcmask (!%p2071_p7), 261120   ;;  %v490_v1 = vld [vmem:[%s3074_s0 + $0x8] sm:$0xff] (!%p2071_p7) }
  0x3b   : > { %s2744_s29 = scalar_select %p456_p10, %s2556_s12, 1 }
  0x3c   : > { %488 = sbr.rel (%p2071_p7) target bundleno = 67 (0x43), region = 64  ;;  %492 = vst.msk [vmem:[#allocation5] sm:$0xff] (!%p2071_p7), %vm491_vm0, %v489_v0  ;;  %493 = vst.msk [vmem:[#allocation5 + $0x8] sm:$0xff] (!%p2071_p7), %vm491_vm0, %v490_v1 }
  0x3d   : > { %s2113_s26 = sshll.u32 %s2744_s29, 4  ;;  %s2116_s16 = sshll.u32 %s2744_s29, 5 }
  0x3e   : > { %s460_s19 = scalar_lea.vmem %s3075_s1, %s2113_s26  ;;  %s2757_s17 = scalar_lea.vmem %s3077_s3, %s2113_s26 }
  0x3f   : > { %s2762_s5 = scalar_lea.vmem %s3078_s4, %s2113_s26  ;;  %s2768_s28 = scalar_lea.vmem %s3080_s6, %s2116_s16 }
  0x40   : > { %s2070_s30 = sshll.u32 %s2744_s29, 3 }
  0x41   : > { %s2774_s27 = scalar_lea.vmem %s3081_s7, %s2070_s30 }
  0x43 PF: > { %v2392_v2 = vld [vmem:[%s460_s19] sm:$0xff]   ;;  %v2567_v3 = vmov 0.0   ;;  %v2393_v4 = vld [vmem:[%s460_s19 + $0x8] sm:$0xff]   ;;  %vm2568_vm1 = vmmov 0   ;;  %vm520_vm2 = vcmask 261120   ;;  %s3097_s21 = scalar_lea.vmem %s3076_s2, %s2744_s29  ;;  %s2569_s25 = smov 96   ;;  %v566_v21 = vlaneseq }
  0x44   : > { %2165 = vmatprep.subr.bf16.mxu0 %v2567_v3  ;;  %2173 = vmatprep.subr.bf16.mxu1 %v2567_v3  ;;  %v2787_v5 = vld [vmem:[#allocation5] sm:$0xff]  ;;  %v2789_v6 = vld [vmem:[#allocation5 + $0x8] sm:$0xff]  ;;  %v2072_v8 = vld [vmem:[%s3097_s21] ss:$0 sm:$0xff]  ;;  %vm579_vm3 = vcmask 64512   ;;  %s2571_s29 = smov 64  }
  0x45   : > { %2166 = vmatpush3.bf16.msra.mxu0 %v2392_v2  ;;  %2169 = vmatprep.mubr.msk.bf16.mxu0 %vm2568_vm1, %v2567_v3  ;;  %v496_v7 = vpack.c.bf16 %v2789_v6, %v2787_v5  ;;  %v2823_v22 = vshrl.u32 %v566_v21, 7  ;;  %v569_v23 = vand.u32 127, %v566_v21  ;;  %v2570_v25 = vmov -1e+30   ;;  %s2572_s19 = smov 88   ;;  %s2573_s18 = smov 120  }
  0x46   : > { %2167 = vmatprep.subr.bf16.mxu0 %v2567_v3  ;;  %2175 = vmatprep.mubr.msk.bf16.mxu1 %vm2568_vm1, %v2567_v3  ;;  %vm707_vm5 = vcmask 1043456   ;;  %s2574_s30 = smov 56   ;;  %s2575_s22 = smov 80   ;;  %vm1497_vm6 = vcmask 130048   ;;  %vm1500_vm7 = vcmask 195584   ;;  %vm1769_vm10 = vcmask 523264  }
  0x47   : > { %vm570_vm4 = vcmp.le.s32.totalorder %v569_v23, %v2823_v22  ;;  %s2576_s20 = smov 112   ;;  %s2577_s23 = smov 48  }
  0x48   : > { %v2826_v26 = vsel %vm570_vm4, 0.0, %v2570_v25  ;;  %s2578_s15 = smov 72   ;;  %s2579_s26 = smov 104  }
  0x49   : > { %2168 = vmatpush3.bf16.msra.mxu0 %v2393_v4  ;;  %s2580_s13 = smov 40   ;;  %s2581_s16 = smov 8  }
  0x4a   : > { %2179 = vmatprep.subr.bf16.mxu0 %v2567_v3  ;;  %s2582_s21 = smov 16   ;;  %p2106_p9 = scmp.ne.s32.totalorder %s2556_s12, 1 }
  0x4c   : > { %2170 = vmatmul.mubr.msk.bf16.vlgmr.msra.gmra.mrb[0].mxu0 %vm520_vm2, %v496_v7 }
  0x4d   : > { %2181 = vmatprep.mubr.msk.bf16.mxu0 %vm2568_vm1, %v2567_v3 }
 0x11f   : > { %v558_v9 = vpop.f32.mrb[0].mxu0 }
 0x120   : > { %v559_v10 = vadd.f32 %v2072_v8, %v558_v9  ;;  %v2171_v11 = vpop.f32.mrb[1].mxu0 }
 0x121   : > { %v561_v12 = vpop.f32.mrb[2].mxu0 }
 0x122   : > { %v2805_v13 = vpack.c.bf16 %v559_v10, %v559_v10  ;;  %v562_v14 = vadd.f32 %v2072_v8, %v561_v12  ;;  %v2172_v15 = vpop.f32.mrb[3].mxu0 }
 0x124   : > { %577 = vrot.lane.b32.xlu0 %v2805_v13, %s2569_s25  ;;  %v2808_v16 = vpack.c.bf16 %v562_v14, %v562_v14 }
 0x128   : > { %626 = vrot.lane.b32.xlu0 %v2808_v16, %s2569_s25  ;;  %s2583_s25 = smov 24  }
 0x196   : > { %v578_v17 = vpop.permute.xlu0 %577 }
 0x197   : > { %v584_v18 = vsel %vm579_vm3, %v578_v17, 0 }
 0x198   : > { %2174 = vmatpush3.bf16.xpose.msra.mxu1 %v584_v18 }
 0x199   : > { %2185 = vmatprep.subr.bf16.mxu1 %v2567_v3 }
 0x19a   : > { %v627_v19 = vpop.permute.xlu0 %626 }
 0x19b   : > { %v632_v20 = vsel %vm579_vm3, %v627_v19, 0 }
 0x19c   : > { %2180 = vmatpush3.bf16.xpose.msra.mxu0 %v632_v20 }
 0x19d   : > { %2191 = vmatprep.subr.bf16.mxu0 %v2567_v3 }
 0x19f   : > { %2176 = vmatmul.mubr.msk.bf16.vlgmr.msra.gmra.mrb[0].mxu1 %vm579_vm3, %v2805_v13 }
 0x1a0   : > { %2187 = vmatprep.mubr.msk.bf16.mxu1 %vm2568_vm1, %v2567_v3 }
 0x1a3   : > { %2182 = vmatmul.mubr.msk.bf16.vlgmr.msra.gmra.mrb[4].mxu0 %vm579_vm3, %v2808_v16 }
 0x1a4   : > { %2193 = vmatprep.mubr.msk.bf16.mxu0 %vm2568_vm1, %v2567_v3 }
 0x272   : > { %v620_v24 = vpop.f32.mrb[0].mxu1 }
 0x273   : > { %v674_v27 = vmul.f32 0.35355338, %v620_v24  ;;  %v2177_v28 = vpop.f32.mrb[1].mxu1 }
 0x274   : > { %v623_v29 = vpop.f32.mrb[2].mxu1 }
 0x275   : > { %v2178_v30 = vpop.f32.mrb[3].mxu1  ;;  %v676_v31 = vadd.f32 %v674_v27, %v2826_v26 }
 0x276   : > { %v668_v32 = vpop.f32.mrb[4].mxu0 }
 0x277   : > { %v675_v33 = vmul.f32 0.35355338, %v668_v32  ;;  %v2183_v34 = vpop.f32.mrb[5].mxu0  ;;  %v678_v35 = vsel %vm579_vm3, %v676_v31, -inf }
 0x278   : > { %679 = vmax.xlane.f32.xlu1 %v678_v35  ;;  %v671_v36 = vpop.f32.mrb[6].mxu0 }
 0x279   : > { %v2184_v37 = vpop.f32.mrb[7].mxu0  ;;  %v677_v38 = vadd.f32 %v675_v33, %v2826_v26 }
 0x27b   : > { %v681_v39 = vsel %vm579_vm3, %v677_v38, -inf }
 0x27c   : > { %682 = vmax.xlane.f32.xlu1 %v681_v39 }
 0x28d   : > { %702 = vrot.lane.b32.xlu1 %v2805_v13, %s2571_s29 }
 0x291   : > { %751 = vrot.lane.b32.xlu1 %v2808_v16, %s2571_s29 }
 0x295   : > { %801 = vrot.lane.b32.xlu1 %v2805_v13, %s2572_s19 }
 0x305   : > { %v680_v40 = vpop.xlane.xlu1 %679 }
 0x306   : > { %v684_v41 = vsub.f32 %v676_v31, %v680_v40 }
 0x308   : > { %v686_v42 = vmul.f32 1.442695, %v684_v41 }
 0x309   : > { %v683_v43 = vpop.xlane.xlu1 %682 }
 0x30a   : > { %2402 = vpow2.f32 %v686_v42  ;;  %v685_v44 = vsub.f32 %v677_v38, %v683_v43 }
 0x30c   : > { %v688_v45 = vmul.f32 1.442695, %v685_v44 }
 0x30d   : > { %v703_v46 = vpop.permute.xlu1 %702 }
 0x30e   : > { %2404 = vpow2.f32 %v688_v45  ;;  %v709_v47 = vsel %vm707_vm5, %v703_v46, 0 }
 0x30f   : > { %2186 = vmatpush3.bf16.msra.mxu1 %v709_v47 }
 0x310   : > { %2197 = vmatprep.subr.bf16.mxu1 %v2567_v3 }
 0x311   : > { %v752_v48 = vpop.permute.xlu1 %751 }
 0x312   : > { %v757_v49 = vsel %vm707_vm5, %v752_v48, 0 }
 0x313   : > { %2192 = vmatpush3.bf16.msra.mxu0 %v757_v49 }
 0x314   : > { %v2403_v50 = vpop.eup %2402  ;;  %2203 = vmatprep.subr.bf16.mxu0 %v2567_v3 }
 0x315   : > { %v690_v51 = vsel %vm579_vm3, %v2403_v50, 0.0  ;;  %v802_v54 = vpop.permute.xlu1 %801 }
 0x316   : > { %691 = vadd.xlane.f32.xlu0 %v690_v51  ;;  %v807_v61 = vsel %vm579_vm3, %v802_v54, 0 }
 0x318   : > { %v2405_v52 = vpop.eup %2404 }
 0x319   : > { %v693_v53 = vsel %vm579_vm3, %v2405_v52, 0.0 }
 0x31a   : > { %694 = vadd.xlane.f32.xlu1 %v693_v53 }
 0x32b   : > { %851 = vrot.lane.b32.xlu1 %v2808_v16, %s2572_s19 }
 0x32c   : > { %799 = vrot.lane.b32.xlu0 %v2805_v13, %s2573_s18 }
 0x32f   : > { %849 = vrot.lane.b32.xlu1 %v2808_v16, %s2573_s18 }
 0x3a3   : > { %v692_v55 = vpop.xlane.xlu0 %691 }
 0x3a4   : > { %2406 = vrcp.f32 %v692_v55 }
 0x3a7   : > { %v695_v56 = vpop.xlane.xlu1 %694  ;;  %v800_v2 = vpop.permute.xlu0 %799 }
 0x3a8   : > { %2408 = vrcp.f32 %v695_v56 }
 0x3ab   : > { %v852_v63 = vpop.permute.xlu1 %851 }
 0x3ac   : > { %v857_v1 = vsel %vm579_vm3, %v852_v63, 0 }
 0x3ae   : > { %v2407_v57 = vpop.eup %2406 }
 0x3af   : > { %v698_v58 = vmul.f32 %v2407_v57, %v2403_v50  ;;  %v850_v4 = vpop.permute.xlu1 %849 }
 0x3b1   : > { %v700_v59 = vpack.c.bf16 %v698_v58, %v698_v58 }
 0x3b2   : > { %v2409_v60 = vpop.eup %2408 }
 0x3b3   : > { %v699_v62 = vmul.f32 %v2409_v60, %v2405_v52  ;;  %2188 = vmatmul.mubr.msk.bf16.vlgmr.msra.gmra.mrb[4].mxu1 %vm579_vm3, %v700_v59 }
 0x3b4   : > { %2198 = vmatpush3.bf16.xpose.msra.mxu1 %v807_v61  ;;  %2199 = vmatprep.mubr.msk.bf16.mxu1 %vm2568_vm1, %v2567_v3 }
 0x3b5   : > { %v701_v0 = vpack.c.bf16 %v699_v62, %v699_v62  ;;  %2209 = vmatprep.subr.bf16.mxu1 %v2567_v3 }
 0x3b7   : > { %2194 = vmatmul.mubr.msk.bf16.vlgmr.msra.gmra.mrb[8].mxu0 %vm579_vm3, %v701_v0 }
 0x3b8   : > { %2204 = vmatpush3.bf16.xpose.msra.mxu0 %v857_v1  ;;  %2205 = vmatprep.mubr.msk.bf16.mxu0 %vm2568_vm1, %v2567_v3 }
 0x3b9   : > { %2215 = vmatprep.subr.bf16.mxu0 %v2567_v3 }
 0x3bb   : > { %2200 = vmatmul.mubr.msk.bf16.vlgmr.msra.gmra.mrb[8].mxu1 %vm579_vm3, %v800_v2 }
 0x3bc   : > { %2211 = vmatprep.mubr.msk.bf16.mxu1 %vm2568_vm1, %v2567_v3 }
 0x3bf   : > { %2206 = vmatmul.mubr.msk.bf16.vlgmr.msra.gmra.mrb[12].mxu0 %vm579_vm3, %v850_v4 }
 0x3c0   : > { %2217 = vmatprep.mubr.msk.bf16.mxu0 %vm2568_vm1, %v2567_v3 }
 0x486   : > { %v2860_v7 = vpop.f32.mrb[4].mxu1 }
 0x487   : > { %v2189_v8 = vpop.f32.mrb[5].mxu1 }
 0x488   : > { %v748_v9 = vpop.f32.mrb[6].mxu1 }
 0x489   : > { %v2190_v10 = vpop.f32.mrb[7].mxu1 }
 0x48a   : > { %v2862_v11 = vpop.f32.mrb[8].mxu0 }
 0x48b   : > { %v2195_v12 = vpop.f32.mrb[9].mxu0 }
 0x48c   : > { %v796_v14 = vpop.f32.mrb[10].mxu0 }
 0x48d   : > { %v2196_v15 = vpop.f32.mrb[11].mxu0 }
 0x48e   : > { %v843_v17 = vpop.f32.mrb[8].mxu1 }
 0x48f   : > { %v899_v18 = vmul.f32 0.35355338, %v843_v17  ;;  %v2201_v19 = vpop.f32.mrb[9].mxu1 }
 0x490   : > { %v846_v20 = vpop.f32.mrb[10].mxu1 }
 0x491   : > { %v2202_v21 = vpop.f32.mrb[11].mxu1  ;;  %v901_v23 = vadd.f32 %v899_v18, %v2826_v26 }
 0x492   : > { %v893_v24 = vpop.f32.mrb[12].mxu0 }
 0x493   : > { %v900_v25 = vmul.f32 0.35355338, %v893_v24  ;;  %v2207_v27 = vpop.f32.mrb[13].mxu0  ;;  %v903_v28 = vsel %vm579_vm3, %v901_v23, -inf }
 0x494   : > { %904 = vmax.xlane.f32.xlu1 %v903_v28  ;;  %v896_v29 = vpop.f32.mrb[14].mxu0 }
 0x495   : > { %v2208_v30 = vpop.f32.mrb[15].mxu0  ;;  %v902_v31 = vadd.f32 %v900_v25, %v2826_v26 }
 0x497   : > { %v906_v32 = vsel %vm579_vm3, %v902_v31, -inf }
 0x498   : > { %907 = vmax.xlane.f32.xlu0 %v906_v32 }
 0x4a5   : > { %927 = vrot.lane.b32.xlu1 %v2805_v13, %s2574_s30 }
 0x4a9   : > { %1025 = vrot.lane.b32.xlu1 %v2805_v13, %s2575_s22 }
 0x4ae   : > { %975 = vrot.lane.b32.xlu0 %v2808_v16, %s2574_s30 }
 0x4b2   : > { %1023 = vrot.lane.b32.xlu0 %v2805_v13, %s2576_s20 }
 0x521   : > { %v905_v33 = vpop.xlane.xlu1 %904 }
 0x522   : > { %v909_v34 = vsub.f32 %v901_v23, %v905_v33 }
 0x524   : > { %v911_v35 = vmul.f32 1.442695, %v909_v34 }
 0x525   : > { %v928_v36 = vpop.permute.xlu1 %927  ;;  %v908_v37 = vpop.xlane.xlu0 %907 }
 0x526   : > { %2410 = vpow2.f32 %v911_v35  ;;  %v933_v38 = vsel %vm707_vm5, %v928_v36, 0  ;;  %v910_v39 = vsub.f32 %v902_v31, %v908_v37 }
 0x527   : > { %2210 = vmatpush3.bf16.msra.mxu1 %v933_v38 }
 0x528   : > { %v913_v40 = vmul.f32 1.442695, %v910_v39  ;;  %2221 = vmatprep.subr.bf16.mxu1 %v2567_v3 }
 0x529   : > { %v976_v41 = vpop.permute.xlu0 %975  ;;  %v1026_v47 = vpop.permute.xlu1 %1025 }
 0x52a   : > { %2412 = vpow2.f32 %v913_v40  ;;  %v981_v42 = vsel %vm707_vm5, %v976_v41, 0  ;;  %v1031_v54 = vsel %vm579_vm3, %v1026_v47, 0 }
 0x52b   : > { %2216 = vmatpush3.bf16.msra.mxu0 %v981_v42 }
 0x52c   : > { %2227 = vmatprep.subr.bf16.mxu0 %v2567_v3 }
 0x52d   : > { %v1024_v59 = vpop.permute.xlu0 %1023 }
 0x530   : > { %v2411_v43 = vpop.eup %2410 }
 0x531   : > { %v915_v44 = vsel %vm579_vm3, %v2411_v43, 0.0 }
 0x532   : > { %916 = vadd.xlane.f32.xlu1 %v915_v44 }
 0x534   : > { %v2413_v45 = vpop.eup %2412 }
 0x535   : > { %v918_v46 = vsel %vm579_vm3, %v2413_v45, 0.0 }
 0x536   : > { %919 = vadd.xlane.f32.xlu1 %v918_v46 }
 0x547   : > { %1075 = vrot.lane.b32.xlu1 %v2808_v16, %s2575_s22 }
 0x54b   : > { %1073 = vrot.lane.b32.xlu1 %v2808_v16, %s2576_s20 }
 0x5bf   : > { %v917_v48 = vpop.xlane.xlu1 %916 }
 0x5c0   : > { %2414 = vrcp.f32 %v917_v48 }
 0x5c3   : > { %v920_v49 = vpop.xlane.xlu1 %919 }
 0x5c4   : > { %2416 = vrcp.f32 %v920_v49 }
 0x5c7   : > { %v1076_v56 = vpop.permute.xlu1 %1075 }
 0x5c8   : > { %v1081_v58 = vsel %vm579_vm3, %v1076_v56, 0 }
 0x5ca   : > { %v2415_v50 = vpop.eup %2414 }
 0x5cb   : > { %v923_v51 = vmul.f32 %v2415_v50, %v2411_v43  ;;  %v1074_v60 = vpop.permute.xlu1 %1073 }
 0x5cd   : > { %v925_v52 = vpack.c.bf16 %v923_v51, %v923_v51 }
 0x5ce   : > { %v2417_v53 = vpop.eup %2416 }
 0x5cf   : > { %v924_v55 = vmul.f32 %v2417_v53, %v2413_v45  ;;  %2212 = vmatmul.mubr.msk.bf16.vlgmr.msra.gmra.mrb[12].mxu1 %vm579_vm3, %v925_v52 }
 0x5d0   : > { %2222 = vmatpush3.bf16.xpose.msra.mxu1 %v1031_v54  ;;  %2223 = vmatprep.mubr.msk.bf16.mxu1 %vm2568_vm1, %v2567_v3 }
 0x5d1   : > { %v926_v57 = vpack.c.bf16 %v924_v55, %v924_v55  ;;  %2233 = vmatprep.subr.bf16.mxu1 %v2567_v3 }
 0x5d3   : > { %2218 = vmatmul.mubr.msk.bf16.vlgmr.msra.gmra.mrb[16].mxu0 %vm579_vm3, %v926_v57 }
 0x5d4   : > { %2228 = vmatpush3.bf16.xpose.msra.mxu0 %v1081_v58  ;;  %2229 = vmatprep.mubr.msk.bf16.mxu0 %vm2568_vm1, %v2567_v3 }
 0x5d5   : > { %2239 = vmatprep.subr.bf16.mxu0 %v2567_v3 }
 0x5d7   : > { %2224 = vmatmul.mubr.msk.bf16.vlgmr.msra.gmra.mrb[16].mxu1 %vm579_vm3, %v1024_v59 }
 0x5d8   : > { %2235 = vmatprep.mubr.msk.bf16.mxu1 %vm2568_vm1, %v2567_v3 }
 0x5db   : > { %2230 = vmatmul.mubr.msk.bf16.vlgmr.msra.gmra.mrb[20].mxu0 %vm579_vm3, %v1074_v60 }
 0x5dc   : > { %2241 = vmatprep.mubr.msk.bf16.mxu0 %vm2568_vm1, %v2567_v3 }
 0x6a2   : > { %v2896_v61 = vpop.f32.mrb[12].mxu1 }
 0x6a3   : > { %v2213_v62 = vpop.f32.mrb[13].mxu1 }
 0x6a4   : > { %v972_v63 = vpop.f32.mrb[14].mxu1 }
 0x6a5   : > { %v2214_v0 = vpop.f32.mrb[15].mxu1 }
 0x6a6   : > { %v2898_v1 = vpop.f32.mrb[16].mxu0 }
 0x6a7   : > { %v2377_v2 = vpack.i.bf16 %v2898_v1, %v2896_v61  ;;  %v2219_v4 = vpop.f32.mrb[17].mxu0 }
 0x6a8   : > { %v1020_v8 = vpop.f32.mrb[18].mxu0 }
 0x6a9   : > { %v2220_v9 = vpop.f32.mrb[19].mxu0 }
 0x6aa   : > { %v1067_v10 = vpop.f32.mrb[16].mxu1 }
 0x6ab   : > { %v1123_v12 = vmul.f32 0.35355338, %v1067_v10  ;;  %v2225_v14 = vpop.f32.mrb[17].mxu1 }
 0x6ac   : > { %v1070_v15 = vpop.f32.mrb[18].mxu1 }
 0x6ad   : > { %v2226_v17 = vpop.f32.mrb[19].mxu1  ;;  %v1125_v18 = vadd.f32 %v1123_v12, %v2826_v26 }
 0x6ae   : > { %v1117_v19 = vpop.f32.mrb[20].mxu0 }
 0x6af   : > { %v1124_v20 = vmul.f32 0.35355338, %v1117_v19  ;;  %v2231_v21 = vpop.f32.mrb[21].mxu0  ;;  %v1127_v23 = vsel %vm579_vm3, %v1125_v18, -inf }
 0x6b0   : > { %1128 = vmax.xlane.f32.xlu0 %v1127_v23  ;;  %v1120_v24 = vpop.f32.mrb[22].mxu0 }
 0x6b1   : > { %v2232_v25 = vpop.f32.mrb[23].mxu0  ;;  %v1126_v27 = vadd.f32 %v1124_v20, %v2826_v26 }
 0x6b3   : > { %v1130_v28 = vsel %vm579_vm3, %v1126_v27, -inf }
 0x6b4   : > { %1131 = vmax.xlane.f32.xlu1 %v1130_v28 }
 0x6c5   : > { %1151 = vrot.lane.b32.xlu1 %v2805_v13, %s2577_s23 }
 0x6c9   : > { %1249 = vrot.lane.b32.xlu1 %v2805_v13, %s2578_s15 }
 0x6cd   : > { %1299 = vrot.lane.b32.xlu1 %v2808_v16, %s2578_s15 }
 0x6d1   : > { %1297 = vrot.lane.b32.xlu1 %v2808_v16, %s2579_s26 }
 0x73d   : > { %v1129_v29 = vpop.xlane.xlu0 %1128 }
 0x73e   : > { %v1133_v30 = vsub.f32 %v1125_v18, %v1129_v29 }
 0x740   : > { %v1135_v31 = vmul.f32 1.442695, %v1133_v30 }
 0x741   : > { %v1132_v32 = vpop.xlane.xlu1 %1131 }
 0x742   : > { %2418 = vpow2.f32 %v1135_v31  ;;  %v1134_v33 = vsub.f32 %v1126_v27, %v1132_v32 }
 0x744   : > { %v1137_v34 = vmul.f32 1.442695, %v1134_v33 }
 0x745   : > { %v1152_v35 = vpop.permute.xlu1 %1151 }
 0x746   : > { %2420 = vpow2.f32 %v1137_v34  ;;  %v1157_v36 = vsel %vm707_vm5, %v1152_v35, 0 }
 0x747   : > { %2234 = vmatpush3.bf16.msra.mxu1 %v1157_v36 }
 0x748   : > { %2245 = vmatprep.subr.bf16.mxu1 %v2567_v3 }
 0x749   : > { %v1250_v46 = vpop.permute.xlu1 %1249 }
 0x74a   : > { %v1255_v50 = vsel %vm579_vm3, %v1250_v46, 0 }
 0x74c   : > { %v2419_v37 = vpop.eup %2418 }
 0x74d   : > { %v1139_v38 = vsel %vm579_vm3, %v2419_v37, 0.0  ;;  %v1300_v52 = vpop.permute.xlu1 %1299 }
 0x74e   : > { %1140 = vadd.xlane.f32.xlu0 %v1139_v38  ;;  %v1305_v54 = vsel %vm579_vm3, %v1300_v52, 0 }
 0x750   : > { %v2421_v39 = vpop.eup %2420 }
 0x751   : > { %v1142_v40 = vsel %vm579_vm3, %v2421_v39, 0.0  ;;  %v1298_v56 = vpop.permute.xlu1 %1297 }
 0x752   : > { %1143 = vadd.xlane.f32.xlu0 %v1142_v40 }
 0x768   : > { %1199 = vrot.lane.b32.xlu0 %v2808_v16, %s2577_s23 }
 0x76c   : > { %1247 = vrot.lane.b32.xlu0 %v2805_v13, %s2579_s26 }
 0x7db   : > { %v1141_v41 = vpop.xlane.xlu0 %1140 }
 0x7dc   : > { %2422 = vrcp.f32 %v1141_v41 }
 0x7df   : > { %v1144_v42 = vpop.xlane.xlu0 %1143 }
 0x7e0   : > { %2424 = vrcp.f32 %v1144_v42 }
 0x7e3   : > { %v1200_v43 = vpop.permute.xlu0 %1199 }
 0x7e4   : > { %v1205_v44 = vsel %vm707_vm5, %v1200_v43, 0 }
 0x7e5   : > { %2240 = vmatpush3.bf16.msra.mxu0 %v1205_v44  ;;  %v2394_v44 = vld [vmem:[%s2757_s17] sm:$0xff]  }
 0x7e6   : > { %v2423_v45 = vpop.eup %2422  ;;  %2251 = vmatprep.subr.bf16.mxu0 %v2567_v3 }
 0x7e7   : > { %v1147_v47 = vmul.f32 %v2423_v45, %v2419_v37  ;;  %v1248_v55 = vpop.permute.xlu0 %1247  ;;  %v2395_v45 = vld [vmem:[%s2757_s17 + $0x8] sm:$0xff]  }
 0x7e9   : > { %v1149_v48 = vpack.c.bf16 %v1147_v47, %v1147_v47 }
 0x7ea   : > { %v2425_v49 = vpop.eup %2424 }
 0x7eb   : > { %v1148_v51 = vmul.f32 %v2425_v49, %v2421_v39  ;;  %2236 = vmatmul.mubr.msk.bf16.vlgmr.msra.gmra.mrb[20].mxu1 %vm579_vm3, %v1149_v48 }
 0x7ec   : > { %2246 = vmatpush3.bf16.xpose.msra.mxu1 %v1255_v50  ;;  %2247 = vmatprep.mubr.msk.bf16.mxu1 %vm2568_vm1, %v2567_v3 }
 0x7ed   : > { %v1150_v53 = vpack.c.bf16 %v1148_v51, %v1148_v51  ;;  %2257 = vmatprep.subr.bf16.mxu1 %v2567_v3 }
 0x7ef   : > { %2242 = vmatmul.mubr.msk.bf16.vlgmr.msra.gmra.mrb[24].mxu0 %vm579_vm3, %v1150_v53 }
 0x7f0   : > { %2252 = vmatpush3.bf16.xpose.msra.mxu0 %v1305_v54  ;;  %2253 = vmatprep.mubr.msk.bf16.mxu0 %vm2568_vm1, %v2567_v3 }
 0x7f1   : > { %2263 = vmatprep.subr.bf16.mxu0 %v2567_v3 }
 0x7f3   : > { %2248 = vmatmul.mubr.msk.bf16.vlgmr.msra.gmra.mrb[24].mxu1 %vm579_vm3, %v1248_v55 }
 0x7f4   : > { %2259 = vmatprep.mubr.msk.bf16.mxu1 %vm2568_vm1, %v2567_v3 }
 0x7f7   : > { %2254 = vmatmul.mubr.msk.bf16.vlgmr.msra.gmra.mrb[28].mxu0 %vm579_vm3, %v1298_v56 }
 0x7f8   : > { %2265 = vmatprep.mubr.msk.bf16.mxu0 %vm2568_vm1, %v2567_v3 }
 0x8be   : > { %v1193_v57 = vpop.f32.mrb[20].mxu1 }
 0x8bf   : > { %v2237_v58 = vpop.f32.mrb[21].mxu1 }
 0x8c0   : > { %v1196_v59 = vpop.f32.mrb[22].mxu1 }
 0x8c1   : > { %v2238_v60 = vpop.f32.mrb[23].mxu1 }
 0x8c2   : > { %v1241_v62 = vpop.f32.mrb[24].mxu0 }
 0x8c3   : > { %v2382_v63 = vpack.i.bf16 %v1241_v62, %v1193_v57  ;;  %v2243_v0 = vpop.f32.mrb[25].mxu0 }
 0x8c4   : > { %v1244_v4 = vpop.f32.mrb[26].mxu0 }
 0x8c5   : > { %v2244_v8 = vpop.f32.mrb[27].mxu0 }
 0x8c6   : > { %v1291_v9 = vpop.f32.mrb[24].mxu1 }
 0x8c7   : > { %v1347_v10 = vmul.f32 0.35355338, %v1291_v9  ;;  %v2249_v12 = vpop.f32.mrb[25].mxu1 }
 0x8c8   : > { %v1294_v14 = vpop.f32.mrb[26].mxu1 }
 0x8c9   : > { %v2250_v15 = vpop.f32.mrb[27].mxu1  ;;  %v1349_v17 = vadd.f32 %v1347_v10, %v2826_v26 }
 0x8ca   : > { %v1341_v18 = vpop.f32.mrb[28].mxu0 }
 0x8cb   : > { %v1348_v19 = vmul.f32 0.35355338, %v1341_v18  ;;  %v2255_v20 = vpop.f32.mrb[29].mxu0  ;;  %v1351_v21 = vsel %vm579_vm3, %v1349_v17, -inf  ;;  %v2969_v18 = vld [vmem:[%s2774_s27] sm:$0x3f] }
 0x8cc   : > { %1352 = vmax.xlane.f32.xlu0 %v1351_v21  ;;  %v1344_v23 = vpop.f32.mrb[30].mxu0 }
 0x8cd   : > { %v2256_v24 = vpop.f32.mrb[31].mxu0  ;;  %v1350_v25 = vadd.f32 %v1348_v19, %v2826_v26 }
 0x8cf   : > { %v1354_v27 = vsel %vm579_vm3, %v1350_v25, -inf }
 0x8d0   : > { %1355 = vmax.xlane.f32.xlu1 %v1354_v27 }
 0x8e1   : > { %1375 = vrot.lane.b32.xlu1 %v2805_v13, %s2580_s13 }
 0x8e5   : > { %2378 = vrot.lane.b32.xlu1 %v2377_v2, %s2581_s16 }
 0x8e9   : > { %2383 = vrot.lane.b32.xlu1 %v2382_v63, %s2582_s21 }
 0x959   : > { %v1353_v28 = vpop.xlane.xlu0 %1352 }
 0x95a   : > { %v1357_v29 = vsub.f32 %v1349_v17, %v1353_v28  ;;  %v1511_v17 = vsub.s32 0, %v2823_v22 }
 0x95c   : > { %v1359_v30 = vmul.f32 1.442695, %v1357_v29 }
 0x95d   : > { %v1356_v31 = vpop.xlane.xlu1 %1355 }
 0x95e   : > { %2426 = vpow2.f32 %v1359_v30  ;;  %v1358_v26 = vsub.f32 %v1350_v25, %v1356_v31 }
 0x960   : > { %v1361_v32 = vmul.f32 1.442695, %v1358_v26 }
 0x961   : > { %v1376_v33 = vpop.permute.xlu1 %1375 }
 0x962   : > { %2428 = vpow2.f32 %v1361_v32  ;;  %v1381_v34 = vsel %vm707_vm5, %v1376_v33, 0 }
 0x963   : > { %2258 = vmatpush3.bf16.msra.mxu1 %v1381_v34 }
 0x964   : > { %2269 = vmatprep.subr.bf16.mxu1 %v2567_v3 }
 0x965   : > { %v2379_v55 = vpop.permute.xlu1 %2378 }
 0x966   : > { %v2381_v57 = vunpack.i.h.bf16 %v2379_v55  ;;  %v2380_v58 = vunpack.i.l.bf16 %v2379_v55  ;;  %v2400_v55 = vld [vmem:[%s2768_s28 + $0x10] sm:$0xff]  }
 0x968   : > { %v2427_v13 = vpop.eup %2426  ;;  %v1496_v63 = vsel %vm579_vm3, %v2862_v11, %v2381_v57  ;;  %v1495_v0 = vsel %vm579_vm3, %v2860_v7, %v2380_v58  ;;  %v1512_v11 = vrot.slane %v2969_v18, %v1511_v17  ;;  %v2097_v57 = vld [vmem:[%s2736_s24] ss:$0 sm:$0xff] }
 0x969   : > { %v1363_v61 = vsel %vm579_vm3, %v2427_v13, 0.0  ;;  %v2384_v56 = vpop.permute.xlu1 %2383 }
 0x96a   : > { %1364 = vadd.xlane.f32.xlu0 %v1363_v61  ;;  %v2386_v59 = vunpack.i.h.bf16 %v2384_v56  ;;  %v2385_v60 = vunpack.i.l.bf16 %v2384_v56  ;;  %v2401_v56 = vld [vmem:[%s2768_s28 + $0x18] sm:$0xff]  }
 0x96c   : > { %v2429_v1 = vpop.eup %2428  ;;  %v1498_v9 = vsel %vm1497_vm6, %v1495_v0, %v2385_v60  ;;  %v1499_v10 = vsel %vm1497_vm6, %v1496_v63, %v2386_v59 }
 0x96d   : > { %v1366_v2 = vsel %vm579_vm3, %v2429_v1, 0.0 }
 0x96e   : > { %1367 = vadd.xlane.f32.xlu0 %v1366_v2  ;;  %v2397_v2 = vld [vmem:[%s2762_s5 + $0x8] sm:$0xff]  }
 0x984   : > { %1423 = vrot.lane.b32.xlu0 %v2808_v16, %s2580_s13 }
 0x9f7   : > { %v1365_v35 = vpop.xlane.xlu0 %1364 }
 0x9f8   : > { %2430 = vrcp.f32 %v1365_v35 }
 0x9fb   : > { %v1368_v36 = vpop.xlane.xlu0 %1367 }
 0x9fc   : > { %2432 = vrcp.f32 %v1368_v36 }
 0x9ff   : > { %v1424_v37 = vpop.permute.xlu0 %1423 }
 0xa00   : > { %v1429_v38 = vsel %vm707_vm5, %v1424_v37, 0 }
 0xa01   : > { %2264 = vmatpush3.bf16.msra.mxu0 %v1429_v38 }
 0xa02   : > { %v2431_v39 = vpop.eup %2430  ;;  %2277 = vmatprep.subr.bf16.mxu0 %v2567_v3 }
 0xa03   : > { %v1371_v40 = vmul.f32 %v2431_v39, %v2427_v13 }
 0xa05   : > { %v1373_v41 = vpack.c.bf16 %v1371_v40, %v1371_v40 }
 0xa06   : > { %v2433_v42 = vpop.eup %2432 }
 0xa07   : > { %v1372_v43 = vmul.f32 %v2433_v42, %v2429_v1  ;;  %2260 = vmatmul.mubr.msk.bf16.vlgmr.msra.gmra.mrb[28].mxu1 %vm579_vm3, %v1373_v41  ;;  %v1600_v41 = vsub.s32 1, %v2823_v22 }
 0xa08   : > { %2273 = vmatprep.mubr.msk.bf16.mxu1 %vm2568_vm1, %v2567_v3  ;;  %2270 = vmatpush3.bf16.msra.mxu1 %v2394_v44 }
 0xa09   : > { %v1374_v16 = vpack.c.bf16 %v1372_v43, %v1372_v43  ;;  %2271 = vmatprep.subr.bf16.mxu1 %v2567_v3  ;;  %v1601_v42 = vrot.slane %v2969_v18, %v1600_v41  ;;  %v1606_v43 = vsub.s32 2, %v2823_v22 }
 0xa0b   : > { %2266 = vmatmul.mubr.msk.bf16.vlgmr.msra.gmra.mrb[32].mxu0 %vm579_vm3, %v1374_v16 }
 0xa0c   : > { %2281 = vmatprep.mubr.msk.bf16.mxu0 %vm2568_vm1, %v2567_v3  ;;  %2272 = vmatpush3.bf16.msra.mxu1 %v2395_v45 }
 0xa0d   : > { %2285 = vmatprep.subr.bf16.mxu1 %v2567_v3 }
 0xada   : > { %v1417_v46 = vpop.f32.mrb[28].mxu1 }
 0xadb   : > { %v2261_v47 = vpop.f32.mrb[29].mxu1 }
 0xadc   : > { %v1420_v48 = vpop.f32.mrb[30].mxu1 }
 0xadd   : > { %v2262_v49 = vpop.f32.mrb[31].mxu1  ;;  %v1607_v48 = vrot.slane %v2969_v18, %v1606_v43 }
 0xade   : > { %v1465_v50 = vpop.f32.mrb[32].mxu0 }
 0xadf   : > { %v2387_v51 = vpack.i.bf16 %v1465_v50, %v1417_v46  ;;  %v2267_v52 = vpop.f32.mrb[33].mxu0 }
 0xae0   : > { %v1468_v53 = vpop.f32.mrb[34].mxu0 }
 0xae1   : > { %2388 = vrot.lane.b32.xlu0 %v2387_v51, %s2583_s25  ;;  %v2268_v54 = vpop.f32.mrb[35].mxu0  ;;  %v2398_v53 = vld [vmem:[%s2768_s28] sm:$0xff]  }
 0xae2   : > { %v2399_v54 = vld [vmem:[%s2768_s28 + $0x8] sm:$0xff]  }
 0xb53   : > { %v2389_v62 = vpop.permute.xlu0 %2388 }
 0xb54   : > { %v2391_v4 = vunpack.i.h.bf16 %v2389_v62  ;;  %v2390_v8 = vunpack.i.l.bf16 %v2389_v62 }
 0xb56   : > { %v1502_v12 = vsel %vm1500_vm7, %v1499_v10, %v2391_v4  ;;  %v1501_v14 = vsel %vm1500_vm7, %v1498_v9, %v2390_v8 }
 0xb57   : > { %v1504_v15 = vpack.c.bf16 %v1502_v12, %v1501_v14 }
 0xb59   : > { %2274 = vmatmul.mubr.msk.bf16.vlgmr.msra.gmra.mrb[32].mxu1 %vm520_vm2, %v1504_v15 }
 0xb5a   : > { %2293 = vmatprep.mubr.msk.bf16.mxu1 %vm2568_vm1, %v2567_v3  ;;  %2286 = vmatpush3.bf16.msra.mxu1 %v2398_v53 }
 0xb5b   : > { %2287 = vmatprep.subr.bf16.mxu1 %v2567_v3 }
 0xb5e   : > { %2288 = vmatpush3.bf16.msra.mxu1 %v2399_v54 }
 0xb5f   : > { %2289 = vmatprep.subr.bf16.mxu1 %v2567_v3 }
 0xb62   : > { %2290 = vmatpush3.bf16.msra.mxu1 %v2400_v55  ;;  %v1743_v55 = vsub.s32 3, %v2823_v22 }
 0xb63   : > { %2291 = vmatprep.subr.bf16.mxu1 %v2567_v3 }
 0xb66   : > { %2292 = vmatpush3.bf16.msra.mxu1 %v2401_v56  ;;  %v1744_v56 = vrot.slane %v2969_v18, %v1743_v55 }
 0xc2c   : > { %v1562_v19 = vpop.f32.mrb[32].mxu1 }
 0xc2d   : > { %v1563_v7 = vadd.f32 %v1562_v19, %v1512_v11  ;;  %v2275_v20 = vpop.f32.mrb[33].mxu1 }
 0xc2e   : > { %v1565_v21 = vpop.f32.mrb[34].mxu1 }
 0xc2f   : > { %v1566_v23 = vadd.f32 %v1565_v21, %v1512_v11  ;;  %v2276_v24 = vpop.f32.mrb[35].mxu1  ;;  %v1569_v25 = vadd.f32 %v1563_v7, %v2787_v5 }
 0xc31   : > { %v1571_v27 = vsel %vm520_vm2, %v1569_v25, 0.0  ;;  %v1570_v28 = vadd.f32 %v1566_v23, %v2789_v6  ;;  %v2396_v6 = vld [vmem:[%s2762_s5] sm:$0xff]  }
 0xc32   : > { %1572 = vadd.xlane.f32.xlu1 %v1571_v27  ;;  %2278 = vmatpush3.bf16.msra.mxu0 %v2396_v6 }
 0xc33   : > { %v1574_v29 = vsel %vm520_vm2, %v1570_v28, 0.0  ;;  %2279 = vmatprep.subr.bf16.mxu0 %v2567_v3 }
 0xc34   : > { %1575 = vadd.xlane.f32.xlu0 %v1574_v29 }
 0xc36   : > { %2280 = vmatpush3.bf16.msra.mxu0 %v2397_v2 }
 0xcbf   : > { %v1573_v30 = vpop.xlane.xlu1 %1572 }
 0xcc0   : > { %v1578_v31 = vmul.f32 0.03125, %v1573_v30 }
 0xcc1   : > { %v1576_v26 = vpop.xlane.xlu0 %1575 }
 0xcc2   : > { %v1580_v32 = vsub.f32 %v1569_v25, %v1578_v31  ;;  %v1579_v33 = vmul.f32 0.03125, %v1576_v26 }
 0xcc4   : > { %v1581_v34 = vsub.f32 %v1570_v28, %v1579_v33  ;;  %v1582_v13 = vmul.f32 %v1580_v32, %v1580_v32 }
 0xcc6   : > { %v1584_v61 = vsel %vm520_vm2, %v1582_v13, 0.0  ;;  %v1583_v5 = vmul.f32 %v1581_v34, %v1581_v34 }
 0xcc7   : > { %1585 = vadd.xlane.f32.xlu0 %v1584_v61 }
 0xcc8   : > { %v1587_v1 = vsel %vm520_vm2, %v1583_v5, 0.0 }
 0xcc9   : > { %1588 = vadd.xlane.f32.xlu1 %v1587_v1 }
 0xd54   : > { %v1586_v35 = vpop.xlane.xlu0 %1585 }
 0xd55   : > { %v1590_v36 = vmul.f32 0.03125, %v1586_v35 }
 0xd56   : > { %v1589_v37 = vpop.xlane.xlu1 %1588 }
 0xd57   : > { %v1592_v38 = vadd.f32 1e-05, %v1590_v36  ;;  %v1591_v39 = vmul.f32 0.03125, %v1589_v37 }
 0xd59   : > { %2434 = vrsqrt.f32 %v1592_v38  ;;  %v1593_v40 = vadd.f32 1e-05, %v1591_v39 }
 0xd5b   : > { %2436 = vrsqrt.f32 %v1593_v40 }
 0xd63   : > { %v2435_v16 = vpop.eup %2434 }
 0xd64   : > { %v1596_v44 = vmul.f32 %v2435_v16, %v1580_v32 }
 0xd65   : > { %v2437_v45 = vpop.eup %2436 }
 0xd66   : > { %v1602_v46 = vmul.f32 %v1601_v42, %v1596_v44  ;;  %v1597_v47 = vmul.f32 %v2437_v45, %v1581_v34 }
 0xd68   : > { %v1603_v49 = vmul.f32 %v1601_v42, %v1597_v47  ;;  %v2985_v50 = vadd.f32 %v1607_v48, %v1602_v46 }
 0xd6a   : > { %v2987_v51 = vadd.f32 %v1607_v48, %v1603_v49 }
 0xd6c   : > { %v1610_v52 = vpack.c.bf16 %v2987_v51, %v2985_v50 }
 0xd6e   : > { %2282 = vmatmul.mubr.msk.bf16.vlgmr.msra.gmra.mrb[36].mxu0 %vm520_vm2, %v1610_v52 }
 0xe41   : > { %v1671_v58 = vpop.f32.mrb[36].mxu0 }
 0xe42   : > { %v1672_v59 = vadd.f32 %v2097_v57, %v1671_v58  ;;  %v2283_v60 = vpop.f32.mrb[37].mxu0 }
 0xe43   : > { %v1674_v62 = vpop.f32.mrb[38].mxu0 }
 0xe44   : > { %v1680_v63 = vmul.f32 0.70710677, %v1672_v59  ;;  %v1675_v0 = vadd.f32 %v2097_v57, %v1674_v62  ;;  %v2284_v4 = vpop.f32.mrb[39].mxu0  ;;  %v1678_v47 = vmul.f32 0.5, %v1672_v59 }
 0xe46   : > { %v1682_v8 = vand.u32 2147483647, %v1680_v63  ;;  %v1681_v9 = vmul.f32 0.70710677, %v1675_v0  ;;  %vm1722_vm8 = vcmp.ge.f32.partialorder %v1680_v63, 0.0  ;;  %v1679_v48 = vmul.f32 0.5, %v1675_v0 }
 0xe48   : > { %v1684_v10 = vmul.f32 0.3275911, %v1682_v8  ;;  %v1683_v12 = vand.u32 2147483647, %v1681_v9  ;;  %v1710_v3 = vsub.f32 0.0, %v1682_v8  ;;  %vm1723_vm9 = vcmp.ge.f32.partialorder %v1681_v9, 0.0 }
 0xe4a   : > { %v1686_v14 = vadd.f32 1.0, %v1684_v10  ;;  %v1685_v15 = vmul.f32 0.3275911, %v1683_v12  ;;  %v1711_v11 = vsub.f32 0.0, %v1683_v12  ;;  %v1712_v7 = vmul.f32 %v1710_v3, %v1682_v8 }
 0xe4c   : > { %2438 = vrcp.f32 %v1686_v14  ;;  %v1687_v17 = vadd.f32 1.0, %v1685_v15  ;;  %v1713_v24 = vmul.f32 %v1711_v11, %v1683_v12  ;;  %v1714_v25 = vmul.f32 1.442695, %v1712_v7 }
 0xe4e   : > { %2440 = vrcp.f32 %v1687_v17  ;;  %v1716_v31 = vmul.f32 1.442695, %v1713_v24 }
 0xe4f   : > { %2442 = vpow2.f32 %v1714_v25 }
 0xe50   : > { %2444 = vpow2.f32 %v1716_v31 }
 0xe56   : > { %v2439_v19 = vpop.eup %2438 }
 0xe57   : > { %v1692_v20 = vmul.f32 1.0614054, %v2439_v19 }
 0xe58   : > { %v2441_v21 = vpop.eup %2440 }
 0xe59   : > { %v1694_v23 = vadd.f32 -1.4531521, %v1692_v20  ;;  %v1693_v27 = vmul.f32 1.0614054, %v2441_v21  ;;  %v2443_v35 = vpop.eup %2442 }
 0xe5a   : > { %v2445_v39 = vpop.eup %2444 }
 0xe5b   : > { %v1696_v28 = vmul.f32 %v2439_v19, %v1694_v23  ;;  %v1695_v29 = vadd.f32 -1.4531521, %v1693_v27  ;;  %v1844_v27 = vsub.s32 4, %v2823_v22 }
 0xe5d   : > { %v1698_v30 = vadd.f32 1.4214138, %v1696_v28  ;;  %v1697_v26 = vmul.f32 %v2441_v21, %v1695_v29  ;;  %v1850_v28 = vsub.s32 5, %v2823_v22  ;;  %v1845_v29 = vrot.slane %v2969_v18, %v1844_v27 }
 0xe5f   : > { %v1700_v32 = vmul.f32 %v2439_v19, %v1698_v30  ;;  %v1699_v33 = vadd.f32 1.4214138, %v1697_v26  ;;  %v1851_v31 = vrot.slane %v2969_v18, %v1850_v28 }
 0xe61   : > { %v1702_v34 = vadd.f32 -0.28449672, %v1700_v32  ;;  %v1701_v13 = vmul.f32 %v2441_v21, %v1699_v33 }
 0xe63   : > { %v1704_v61 = vmul.f32 %v2439_v19, %v1702_v34  ;;  %v1703_v5 = vadd.f32 -0.28449672, %v1701_v13 }
 0xe65   : > { %v1706_v1 = vadd.f32 0.2548296, %v1704_v61  ;;  %v1705_v6 = vmul.f32 %v2441_v21, %v1703_v5 }
 0xe67   : > { %v1708_v2 = vmul.f32 %v2439_v19, %v1706_v1  ;;  %v1707_v36 = vadd.f32 0.2548296, %v1705_v6 }
 0xe69   : > { %v1718_v37 = vmul.f32 %v2443_v35, %v1708_v2  ;;  %v1709_v38 = vmul.f32 %v2441_v21, %v1707_v36 }
 0xe6b   : > { %v1720_v40 = vsub.f32 1.0, %v1718_v37  ;;  %v1719_v41 = vmul.f32 %v2445_v39, %v1709_v38 }
 0xe6d   : > { %v1724_v42 = vsub.f32 0.0, %v1720_v40  ;;  %v1721_v43 = vsub.f32 1.0, %v1719_v41 }
 0xe6f   : > { %v1726_v16 = vsel %vm1722_vm8, %v1720_v40, %v1724_v42  ;;  %v1725_v44 = vsub.f32 0.0, %v1721_v43 }
 0xe70   : > { %v1728_v45 = vadd.f32 1.0, %v1726_v16 }
 0xe71   : > { %v1727_v46 = vsel %vm1723_vm9, %v1721_v43, %v1725_v44 }
 0xe72   : > { %v1729_v49 = vadd.f32 1.0, %v1727_v46  ;;  %v1730_v52 = vmul.f32 %v1728_v45, %v1678_v47 }
 0xe74   : > { %v1731_v53 = vmul.f32 %v1729_v49, %v1679_v48  ;;  %v2107_v48 = vld [vmem:[%s3082_s8] ss:$0 sm:$0xff] (!%p2106_p9) }
 0xe76   : > { %v1732_v54 = vpack.c.bf16 %v1731_v53, %v1730_v52  ;;  %v2108_v52 = vld [vmem:[%s3082_s8 + $0x1] ss:$0 sm:$0xff] (!%p2106_p9) }
 0xe78   : > { %2294 = vmatmul.mubr.msk.bf16.vlgmr.msra.gmra.mrb[36].mxu1 %vm1769_vm10, %v1732_v54 }
 0xf4b   : > { %v1807_v57 = vpop.f32.mrb[36].mxu1 }
 0xf4c   : > { %v1808_v58 = vadd.f32 %v1807_v57, %v1744_v56  ;;  %v2295_v60 = vpop.f32.mrb[37].mxu1 }
 0xf4d   : > { %v1810_v62 = vpop.f32.mrb[38].mxu1 }
 0xf4e   : > { %v1811_v63 = vadd.f32 %v1810_v62, %v1744_v56  ;;  %v2296_v4 = vpop.f32.mrb[39].mxu1  ;;  %v1814_v8 = vadd.f32 %v1808_v58, %v2985_v50 }
 0xf50   : > { %v1816_v59 = vsel %vm520_vm2, %v1814_v8, 0.0  ;;  %v1815_v0 = vadd.f32 %v1811_v63, %v2987_v51 }
 0xf51   : > { %1817 = vadd.xlane.f32.xlu0 %v1816_v59 }
 0xf52   : > { %v1819_v9 = vsel %vm520_vm2, %v1815_v0, 0.0 }
 0xf53   : > { %1820 = vadd.xlane.f32.xlu1 %v1819_v9 }
 0xfde   : > { %v1818_v10 = vpop.xlane.xlu0 %1817 }
 0xfdf   : > { %v1822_v12 = vmul.f32 0.03125, %v1818_v10 }
 0xfe0   : > { %v1821_v14 = vpop.xlane.xlu1 %1820 }
 0xfe1   : > { %v1824_v15 = vsub.f32 %v1814_v8, %v1822_v12  ;;  %v1823_v17 = vmul.f32 0.03125, %v1821_v14 }
 0xfe3   : > { %v1825_v3 = vsub.f32 %v1815_v0, %v1823_v17  ;;  %v1826_v11 = vmul.f32 %v1824_v15, %v1824_v15 }
 0xfe5   : > { %v1828_v19 = vsel %vm520_vm2, %v1826_v11, 0.0  ;;  %v1827_v7 = vmul.f32 %v1825_v3, %v1825_v3 }
 0xfe6   : > { %1829 = vadd.xlane.f32.xlu0 %v1828_v19 }
 0xfe7   : > { %v1831_v50 = vsel %vm520_vm2, %v1827_v7, 0.0 }
 0xfe8   : > { %1832 = vadd.xlane.f32.xlu1 %v1831_v50 }
0x1073   : > { %v1830_v20 = vpop.xlane.xlu0 %1829 }
0x1074   : > { %v1834_v51 = vmul.f32 0.03125, %v1830_v20 }
0x1075   : > { %v1833_v21 = vpop.xlane.xlu1 %1832 }
0x1076   : > { %v1836_v23 = vadd.f32 1e-05, %v1834_v51  ;;  %v1835_v24 = vmul.f32 0.03125, %v1833_v21 }
0x1078   : > { %2446 = vrsqrt.f32 %v1836_v23  ;;  %v1837_v25 = vadd.f32 1e-05, %v1835_v24 }
0x107a   : > { %2448 = vrsqrt.f32 %v1837_v25 }
0x1082   : > { %v2447_v30 = vpop.eup %2446 }
0x1083   : > { %v1840_v26 = vmul.f32 %v2447_v30, %v1824_v15 }
0x1084   : > { %v2449_v32 = vpop.eup %2448 }
0x1085   : > { %v1846_v33 = vmul.f32 %v1845_v29, %v1840_v26  ;;  %v1841_v34 = vmul.f32 %v2449_v32, %v1825_v3  ;;  %1859 = sbr.rel (%p2106_p9) target bundleno = 4551 (0x11c7), region = 68 }
0x1087   : > { %v1852_v13 = vadd.f32 %v1851_v31, %v1846_v33  ;;  %v1847_v61 = vmul.f32 %v1845_v29, %v1841_v34 }
0x1089   : > { %1854 = vst.msk [vmem:[#allocation5] sm:$0xff] %vm520_vm2, %v1852_v13  ;;  %v1853_v5 = vadd.f32 %v1851_v31, %v1847_v61  ;;  %v1862_v22 = vsel (!%p2106_p9), %vm520_vm2, %v1852_v13, 0.0 }
0x108a   : > { %1863 = vadd.xlane.f32.xlu0 (!%p2106_p9), %v1862_v22 }
0x108b   : > { %1855 = vst.msk [vmem:[#allocation5 + $0x8] sm:$0xff] %vm520_vm2, %v1853_v5  ;;  %v1865_v1 = vsel (!%p2106_p9), %vm520_vm2, %v1853_v5, 0.0 }
0x108e   : > { %1866 = vadd.xlane.f32.xlu0 %v1865_v1 }
0x1117   : > { %v1864_v18 = vpop.xlane.xlu0 %1863 }
0x1118   : > { %v1868_v6 = vmul.f32 0.03125, %v1864_v18 }
0x111a   : > { %v1870_v2 = vsub.f32 %v1852_v13, %v1868_v6 }
0x111b   : > { %v1867_v35 = vpop.xlane.xlu0 %1866 }
0x111c   : > { %v1869_v36 = vmul.f32 0.03125, %v1867_v35  ;;  %v1872_v37 = vmul.f32 %v1870_v2, %v1870_v2 }
0x111e   : > { %v1871_v38 = vsub.f32 %v1853_v5, %v1869_v36  ;;  %v1874_v39 = vsel %vm520_vm2, %v1872_v37, 0.0 }
0x111f   : > { %1875 = vadd.xlane.f32.xlu1 %v1874_v39 }
0x1120   : > { %v1873_v40 = vmul.f32 %v1871_v38, %v1871_v38 }
0x1122   : > { %v1877_v41 = vsel %vm520_vm2, %v1873_v40, 0.0 }
0x1123   : > { %1878 = vadd.xlane.f32.xlu1 %v1877_v41 }
0x11ac   : > { %v1876_v42 = vpop.xlane.xlu1 %1875 }
0x11ad   : > { %v1880_v43 = vmul.f32 0.03125, %v1876_v42 }
0x11af   : > { %v1882_v16 = vadd.f32 1e-05, %v1880_v43 }
0x11b0   : > { %v1879_v44 = vpop.xlane.xlu1 %1878 }
0x11b1   : > { %2450 = vrsqrt.f32 %v1882_v16  ;;  %v1881_v45 = vmul.f32 0.03125, %v1879_v44 }
0x11b3   : > { %v1883_v46 = vadd.f32 1e-05, %v1881_v45 }
0x11b5   : > { %2452 = vrsqrt.f32 %v1883_v46 }
0x11bb   : > { %v2451_v47 = vpop.eup %2450 }
0x11bc   : > { %v1886_v49 = vmul.f32 %v2451_v47, %v1870_v2 }
0x11be   : > { %v1892_v53 = vmul.f32 %v2107_v48, %v1886_v49 }
0x11bf   : > { %v2453_v54 = vpop.eup %2452 }
0x11c0   : > { %v1898_v55 = vadd.f32 %v2108_v52, %v1892_v53  ;;  %v1887_v56 = vmul.f32 %v2453_v54, %v1871_v38 }
0x11c2   : > { %1900 = vst.msk [vmem:[#allocation5] sm:$0xff] %vm520_vm2, %v1898_v55  ;;  %v1893_v57 = vmul.f32 %v2107_v48, %v1887_v56 }
0x11c4   : > { %v1899_v58 = vadd.f32 %v2108_v52, %v1893_v57 }
0x11c6   : > { %1901 = vst.msk [vmem:[#allocation5 + $0x8] sm:$0xff] %vm520_vm2, %v1899_v58 }
0x11c7 PF: > { %s3098_s28 = sadd.s32 4294967295, %s2564_s14   ;;  %s2584_s29 = smov [#allocation5]  }
0x11c8   : > { %p3029_p11 = scmp.eq.s32.totalorder %s3098_s28, 1  ;;  %s1911_s19 = sshll.u32 %s2584_s29, 4  ;;  %s1912_s19 = int_to_ptr.vmem [resolvable:$true] %s1911_s19 }
0x11c9   : > { %s2484_s18 = scalar_lea.vmem %s1912_s19, 256  ;;  %p2491_p0 = scmp.lt.s32.totalorder %s1912_s19, %s1912_s19 }
0x11ca   : > { %p2485_p6 = scmp.ne.s32.totalorder %s1912_s19, %s2484_s18  ;;  %p2492_p2 = scmp.lt.s32.totalorder %s2484_s18, %s2484_s18 }
0x11cc   : > { %p2486_p8 = pnand %p2485_p6, %p3029_p11  ;;  %p2493_p3 = por %p2492_p2, %p2491_p0 }
0x11ce   : > { %p2487_p12 = pneg %p2486_p8 }
0x11d0   : > { %p2494_p4 = pnand %p2493_p3, %p2487_p12 }
0x11d2   : > { %2497 = shalt.err (!%p2494_p4)
}
0x11d3   : > { %s2498_s20 = scalar_lea.hbm %s3083_s9, 256 }
0x11d4   : > { %p2499_p1 = scmp.ne.s32.totalorder %s3083_s9, %s2498_s20  ;;  %p2504_p10 = scmp.lt.u32.totalorder %s2498_s20, %s3083_s9 }
0x11d6   : > { %p2500_p5 = pnand %p2499_p1, %p3029_p11 }
0x11d8   : > { %p2501_p13 = pneg %p2500_p5 }
0x11da   : > { %p2506_p7 = pnand %p2504_p10, %p2501_p13 }
0x11dc   : > { %2509 = shalt.err (!%p2506_p7)
}
0x11dd   : > { %s2585_s21 = smov 128  }
0x11de   : > { %2300 = dma.vmem_to_hbm [thread:$0]  (%p3029_p11), %s1912_s19, 256, %s3083_s9, [#allocation4], %s2585_s21, %s2585_s21, %s2581_s16  }
0x11df   : > { %2539 = dma.done.wait (%p3029_p11), [#allocation4], 256  }
0x11e0   : > { %2541 = vsyncadd (%p3029_p11), [#allocation4], 4294967040 }
0x11e1 PF: > { %s23_s14 = sadd.s32 1, %s2564_s14   ;;  %s3100_s12 = sld [smem:[#allocation10_spill]] }
0x11e2   : > { %p20_p9 = scmp.ge.s32.totalorder %s23_s14, 4   ;;  %s3101_s24 = sld [smem:[#allocation8_spill]] }
0x11e3   : > { %s3102_s13 = sld [smem:[#allocation9_spill]]  ;;  %s3103_s30 = smov %s2548_s10 }
0x11e4   : > { %s3104_s10 = smov %s2552_s11  ;;  %22 = sbr.rel (!%p20_p9) target bundleno = 7 (0x7), region = 123 }
0x11e7   : > { %s3105_s11 = smov %s3100_s12 }
0x11e8   : > { %s3106_s12 = smov %s3101_s24 }
0x11eb   :  { %1927 = vsyncpa [#allocation3], 1 }
0x11ec   :  { %1929 = vsyncpa [#allocation3 + $0x1], 1 }
0x11ed   :  { %1930 = vsyncpa [#allocation4], 1 }
0x11ee   :  { %1932 = vsyncpa [#allocation4 + $0x1], 1 }

</bundles_post_ra>
